<compile_context>
chip_gen: v7x
topology: tpu7x:2x2x1
jax: 0.10.0
libtpu: 0.0.40
codegen_flags: <defaults>
</compile_context>

<pallas_src>
import functools

import jax
import jax.numpy as jnp
from jax.experimental import pallas as pl
from jax.experimental.pallas import tpu as pltpu


def mlp_kernel(x_ref, w1_ref, b1_ref, w2_ref, b2_ref, w3_ref, b3_ref, o_ref):
    # Whole forward fused: bf16 inputs/weights on the MXU, f32 accumulation,
    # ReLU on the VPU, activations re-quantized to bf16 between layers.
    x = x_ref[...]                                                    # bf16
    h1 = jnp.dot(x, w1_ref[...], preferred_element_type=jnp.float32) + b1_ref[...]
    h1 = jnp.maximum(h1, 0.0).astype(jnp.bfloat16)
    h2 = jnp.dot(h1, w2_ref[...], preferred_element_type=jnp.float32) + b2_ref[...]
    h2 = jnp.maximum(h2, 0.0).astype(jnp.bfloat16)
    out = jnp.dot(h2, w3_ref[...], preferred_element_type=jnp.float32) + b3_ref[...]
    o_ref[...] = out.astype(o_ref.dtype)                              # lane-dense f32 store


def _pick_block_b(batch, max_block=512):
    """Big batch tiles for MXU occupancy, but >= 2 grid steps when possible
    (keeps both v7x TensorCores busy); rows kept sublane (8) aligned."""
    if batch <= 8:
        return batch                       # block == full batch dim is always legal
    block = min(max_block, pl.cdiv(batch, 2))
    return max(8, (block // 8) * 8)


@functools.partial(jax.jit, static_argnames=("block_b",))
def _forward_impl(x, w1, b1, w2, b2, w3, b3, *, block_b):
    B, D_in = x.shape
    H1 = w1.shape[1]
    H2 = w2.shape[1]
    D_out = w3.shape[1]
    D_out_pad = 128                        # lane-dense output slab; sliced below

    # bf16 inputs/weights (f32 accumulate in-kernel). Biases stay f32.
    xb = x.astype(jnp.bfloat16)
    w1b = w1.astype(jnp.bfloat16)
    w2b = w2.astype(jnp.bfloat16)
    w3p = jnp.pad(w3, ((0, 0), (0, D_out_pad - D_out))).astype(jnp.bfloat16)
    b3p = jnp.pad(b3, ((0, 0), (0, D_out_pad - D_out))).astype(jnp.float32)
    b1f = b1.astype(jnp.float32)
    b2f = b2.astype(jnp.float32)

    grid = (pl.cdiv(B, block_b),)

    # Weights/biases are grid-invariant: constant index_map + single buffer.
    full = lambda i: (0, 0)
    single = pl.Buffered(1)

    flops = 2 * B * (D_in * H1 + H1 * H2 + H2 * D_out)
    bytes_accessed = (
        B * D_in * 2                                   # x (bf16)
        + (D_in * H1 + H1 * H2 + H2 * D_out_pad) * 2   # weights (bf16)
        + (H1 + H2 + D_out_pad) * 4                    # biases (f32)
        + B * D_out_pad * 4                            # padded output (f32)
    )

    out_padded = pl.pallas_call(
        mlp_kernel,
        out_shape=jax.ShapeDtypeStruct((B, D_out_pad), jnp.float32),
        grid_spec=pltpu.PrefetchScalarGridSpec(
            num_scalar_prefetch=0,
            grid=grid,
            in_specs=[
                pl.BlockSpec((block_b, D_in), lambda i: (i, 0)),
                pl.BlockSpec((D_in, H1), full, pipeline_mode=single),
                pl.BlockSpec((1, H1), full, pipeline_mode=single),
                pl.BlockSpec((H1, H2), full, pipeline_mode=single),
                pl.BlockSpec((1, H2), full, pipeline_mode=single),
                pl.BlockSpec((H2, D_out_pad), full, pipeline_mode=single),
                pl.BlockSpec((1, D_out_pad), full, pipeline_mode=single),
            ],
            out_specs=pl.BlockSpec((block_b, D_out_pad), lambda i: (i, 0)),
        ),
        compiler_params=pltpu.CompilerParams(
            dimension_semantics=("parallel",),
        ),
        cost_estimate=pl.CostEstimate(
            flops=flops, transcendentals=0, bytes_accessed=bytes_accessed
        ),
    )(xb, w1b, b1f, w2b, b2f, w3p, b3p)

    return out_padded[:, :D_out]


def molecular_model_forward(x, w1, b1, w2, b2, w3, b3, block_b=None):
    if block_b is None:
        block_b = _pick_block_b(x.shape[0])
    return _forward_impl(x, w1, b1, w2, b2, w3, b3, block_b=block_b)


def init_params(key, input_size=1024):
    """Deterministic init mimicking nn.Linear default (uniform +-1/sqrt(fan_in))."""
    dims = [(input_size, 512), (512, 256), (256, 2)]
    params = []
    for fan_in, fan_out in dims:
        key, kw, kb = jax.random.split(key, 3)
        bound = 1.0 / (fan_in ** 0.5)
        w = jax.random.uniform(kw, (fan_in, fan_out), jnp.float32, -bound, bound)
        b = jax.random.uniform(kb, (1, fan_out), jnp.float32, -bound, bound)
        params.extend([w, b])
    return params


def reference_forward(x, w1, b1, w2, b2, w3, b3):
    # Mirror the kernel's numerics: bf16 matmul inputs, f32 accumulation.
    f32 = lambda a: a.astype(jnp.bfloat16).astype(jnp.float32)
    h1 = jnp.maximum(f32(x) @ f32(w1) + b1, 0.0)
    h2 = jnp.maximum(f32(h1) @ f32(w2) + b2, 0.0)
    return f32(h2) @ f32(w3) + b3


if __name__ == "__main__":
    key = jax.random.PRNGKey(0)
    kx, kp = jax.random.split(key)

    B, input_size = 256, 1024
    x = jax.random.normal(kx, (B, input_size), jnp.float32)
    w1, b1, w2, b2, w3, b3 = init_params(kp, input_size)

    out = molecular_model_forward(x, w1, b1, w2, b2, w3, b3)
    out = jax.block_until_ready(out)

    ref = reference_forward(x, w1, b1, w2, b2, w3, b3)
    assert out.shape == (B, 2)
    assert jnp.allclose(out, ref, atol=1e-2, rtol=1e-2)

    print("KERNEL_OK")
</pallas_src>

<mosaic_0001>
module attributes {stable_mosaic.version = 11 : i64} {
  func.func @mlp_kernel(%arg0: i32, %arg1: memref<128x1024xbf16, #tpu.memory_space<vmem>>, %arg2: memref<1024x512xbf16, #tpu.memory_space<vmem>>, %arg3: memref<1x512xf32, #tpu.memory_space<vmem>>, %arg4: memref<512x256xbf16, #tpu.memory_space<vmem>>, %arg5: memref<1x256xf32, #tpu.memory_space<vmem>>, %arg6: memref<256x128xbf16, #tpu.memory_space<vmem>>, %arg7: memref<1x128xf32, #tpu.memory_space<vmem>>, %arg8: memref<128x128xf32, #tpu.memory_space<vmem>>) attributes {dimension_semantics = [#tpu.dimension_semantics<parallel>], iteration_bounds = array<i64: 2>, scalar_prefetch = 0 : i64, scratch_operands = 0 : i64, tpu.core_type = #tpu.core_type<tc>, window_params = [{transform_indices = @transform_0, window_bounds = array<i64: 128, 1024>}, {pipeline_mode = #tpu.pipeline_mode<synchronous>, transform_indices = @transform_1, window_bounds = array<i64: 1024, 512>}, {pipeline_mode = #tpu.pipeline_mode<synchronous>, transform_indices = @transform_2, window_bounds = array<i64: 1, 512>}, {pipeline_mode = #tpu.pipeline_mode<synchronous>, transform_indices = @transform_3, window_bounds = array<i64: 512, 256>}, {pipeline_mode = #tpu.pipeline_mode<synchronous>, transform_indices = @transform_4, window_bounds = array<i64: 1, 256>}, {pipeline_mode = #tpu.pipeline_mode<synchronous>, transform_indices = @transform_5, window_bounds = array<i64: 256, 128>}, {pipeline_mode = #tpu.pipeline_mode<synchronous>, transform_indices = @transform_6, window_bounds = array<i64: 1, 128>}, {transform_indices = @transform_7, window_bounds = array<i64: 128, 128>}]} {
    %c0 = arith.constant 0 : index
    %c0_0 = arith.constant 0 : index
    %0 = vector.load %arg1[%c0, %c0_0] : memref<128x1024xbf16, #tpu.memory_space<vmem>>, vector<128x1024xbf16>
    %c0_1 = arith.constant 0 : index
    %c0_2 = arith.constant 0 : index
    %1 = vector.load %arg2[%c0_1, %c0_2] : memref<1024x512xbf16, #tpu.memory_space<vmem>>, vector<1024x512xbf16>
    %cst = arith.constant dense<0.000000e+00> : vector<128x512xf32>
    %2 = tpu.matmul %0, %1, %cst {dimension_numbers = #tpu.dot_dimension_numbers<[1], [0], [0], [1], [0, 0, 1, 1], [], []>} : vector<128x1024xbf16>, vector<1024x512xbf16>, vector<128x512xf32> -> vector<128x512xf32>
    %c0_3 = arith.constant 0 : index
    %c0_4 = arith.constant 0 : index
    %3 = vector.load %arg3[%c0_3, %c0_4] : memref<1x512xf32, #tpu.memory_space<vmem>>, vector<1x512xf32>
    %4 = vector.broadcast %3 : vector<1x512xf32> to vector<128x512xf32>
    %5 = arith.addf %2, %4 : vector<128x512xf32>
    %cst_5 = arith.constant 0.000000e+00 : f32
    %6 = vector.broadcast %cst_5 : f32 to vector<128x512xf32>
    %7 = arith.maximumf %5, %6 : vector<128x512xf32>
    %8 = arith.truncf %7 : vector<128x512xf32> to vector<128x512xbf16>
    %c0_6 = arith.constant 0 : index
    %c0_7 = arith.constant 0 : index
    %9 = vector.load %arg4[%c0_6, %c0_7] : memref<512x256xbf16, #tpu.memory_space<vmem>>, vector<512x256xbf16>
    %cst_8 = arith.constant dense<0.000000e+00> : vector<128x256xf32>
    %10 = tpu.matmul %8, %9, %cst_8 {dimension_numbers = #tpu.dot_dimension_numbers<[1], [0], [0], [1], [0, 0, 1, 1], [], []>} : vector<128x512xbf16>, vector<512x256xbf16>, vector<128x256xf32> -> vector<128x256xf32>
    %c0_9 = arith.constant 0 : index
    %c0_10 = arith.constant 0 : index
    %11 = vector.load %arg5[%c0_9, %c0_10] : memref<1x256xf32, #tpu.memory_space<vmem>>, vector<1x256xf32>
    %12 = vector.broadcast %11 : vector<1x256xf32> to vector<128x256xf32>
    %13 = arith.addf %10, %12 : vector<128x256xf32>
    %cst_11 = arith.constant 0.000000e+00 : f32
    %14 = vector.broadcast %cst_11 : f32 to vector<128x256xf32>
    %15 = arith.maximumf %13, %14 : vector<128x256xf32>
    %16 = arith.truncf %15 : vector<128x256xf32> to vector<128x256xbf16>
    %c0_12 = arith.constant 0 : index
    %c0_13 = arith.constant 0 : index
    %17 = vector.load %arg6[%c0_12, %c0_13] : memref<256x128xbf16, #tpu.memory_space<vmem>>, vector<256x128xbf16>
    %cst_14 = arith.constant dense<0.000000e+00> : vector<128x128xf32>
    %18 = tpu.matmul %16, %17, %cst_14 {dimension_numbers = #tpu.dot_dimension_numbers<[1], [0], [0], [1], [0, 0, 1, 1], [], []>} : vector<128x256xbf16>, vector<256x128xbf16>, vector<128x128xf32> -> vector<128x128xf32>
    %c0_15 = arith.constant 0 : index
    %c0_16 = arith.constant 0 : index
    %19 = vector.load %arg7[%c0_15, %c0_16] : memref<1x128xf32, #tpu.memory_space<vmem>>, vector<1x128xf32>
    %20 = vector.broadcast %19 : vector<1x128xf32> to vector<128x128xf32>
    %21 = arith.addf %18, %20 : vector<128x128xf32>
    %c0_17 = arith.constant 0 : index
    %c0_18 = arith.constant 0 : index
    %22 = vector.load %arg8[%c0_17, %c0_18] : memref<128x128xf32, #tpu.memory_space<vmem>>, vector<128x128xf32>
    tpu.vector_store %arg8[%c0_17, %c0_18], %21 {strides = array<i32>} : memref<128x128xf32, #tpu.memory_space<vmem>>, vector<128x128xf32>,
    return
  }
  func.func @transform_0(%arg0: i32) -> (i32, i32) {
    %c0_i32 = arith.constant 0 : i32
    %c0_i32_0 = arith.constant 0 : i32
    return %arg0, %c0_i32 : i32, i32
  }
  func.func @transform_1(%arg0: i32) -> (i32, i32) {
    %c0_i32 = arith.constant 0 : i32
    %c0_i32_0 = arith.constant 0 : i32
    %c0_i32_1 = arith.constant 0 : i32
    return %c0_i32, %c0_i32_0 : i32, i32
  }
  func.func @transform_2(%arg0: i32) -> (i32, i32) {
    %c0_i32 = arith.constant 0 : i32
    %c0_i32_0 = arith.constant 0 : i32
    %c0_i32_1 = arith.constant 0 : i32
    return %c0_i32, %c0_i32_0 : i32, i32
  }
  func.func @transform_3(%arg0: i32) -> (i32, i32) {
    %c0_i32 = arith.constant 0 : i32
    %c0_i32_0 = arith.constant 0 : i32
    %c0_i32_1 = arith.constant 0 : i32
    return %c0_i32, %c0_i32_0 : i32, i32
  }
  func.func @transform_4(%arg0: i32) -> (i32, i32) {
    %c0_i32 = arith.constant 0 : i32
    %c0_i32_0 = arith.constant 0 : i32
    %c0_i32_1 = arith.constant 0 : i32
    return %c0_i32, %c0_i32_0 : i32, i32
  }
  func.func @transform_5(%arg0: i32) -> (i32, i32) {
    %c0_i32 = arith.constant 0 : i32
    %c0_i32_0 = arith.constant 0 : i32
    %c0_i32_1 = arith.constant 0 : i32
    return %c0_i32, %c0_i32_0 : i32, i32
  }
  func.func @transform_6(%arg0: i32) -> (i32, i32) {
    %c0_i32 = arith.constant 0 : i32
    %c0_i32_0 = arith.constant 0 : i32
    %c0_i32_1 = arith.constant 0 : i32
    return %c0_i32, %c0_i32_0 : i32, i32
  }
  func.func @transform_7(%arg0: i32) -> (i32, i32) {
    %c0_i32 = arith.constant 0 : i32
    %c0_i32_0 = arith.constant 0 : i32
    return %arg0, %c0_i32 : i32, i32
  }
}

</mosaic_0001>

<bundles_post_ra>
// kernel: _forward_impl.1
= control target key start
LH: loop header
LB: loop body
LE: loop exit
PB: predicated region body
PF: predicated region fallthrough
CT: control target
= control target key end

     0   :  { %s5584_s24 = smov 0   ;;  %s7024_s0 = inlined_call_operand.vmem [shape: bf16[256,1024], index: 0, kind: input, shape index: {}]   ;;  %s7025_s1 = inlined_call_operand.vmem [shape: bf16[1024,512], index: 1, kind: input, shape index: {}]   ;;  %s7026_s2 = inlined_call_operand.vmem [shape: f32[1,512], index: 2, kind: input, shape index: {}]   ;;  %s7027_s3 = inlined_call_operand.vmem [shape: bf16[512,256], index: 3, kind: input, shape index: {}]   ;;  %s7028_s4 = inlined_call_operand.vmem [shape: f32[1,256], index: 4, kind: input, shape index: {}]   ;;  %s7029_s5 = inlined_call_operand.vmem [shape: bf16[256,128], index: 5, kind: input, shape index: {}]   ;;  %s7030_s6 = inlined_call_operand.vmem [shape: f32[1,128], index: 6, kind: input, shape index: {}]   ;;  %s7031_s7 = inlined_call_operand.vmem [shape: f32[256,128], index: 7, kind: output, shape index: {}]  }
   0x1 LB: > { %s4202_s25 = sadd.s32 4294967295, %s5542_s24   ;;  %p4206_p0 = scmp.ge.s32.totalorder %s5542_s24, 1  ;;  %s5542_s24 = sphi %s5584_s24, %s17_s24  }
   0x2   : > { %p239_p1 = scmp.lt.s32.totalorder %s5542_s24, 3 }
   0x4   : > { %p240_p2 = pnand %p4206_p0, %p239_p1 }
   0x5   : > { %v5040_v0 = vld [vmem:[%s7025_s1 + $0x4] ss:$16 sps:$4 sm:$0xff] (!%p240_p2)   ;;  %v5042_v1 = vld [vmem:[%s7025_s1 + $0xc] ss:$16 sps:$4 sm:$0xff] (!%p240_p2)   ;;  %v5044_v2 = vld [vmem:[%s7025_s1] ss:$16 sps:$4 sm:$0xff] (!%p240_p2)  }
   0x6   : > { %243 = sbr.rel (%p240_p2) target bundleno = 1046 (0x416), region = 48  ;;  %2228 = vmatprep.subr.bf16.mxu0 (!%p240_p2), %v5040_v0  ;;  %v5045_v3 = vld [vmem:[%s7025_s1 + $0x8] ss:$16 sps:$4 sm:$0xff] (!%p240_p2)   ;;  %2680 = vmatprep.subr.bf16.mxu1 (!%p240_p2), %v5042_v1  ;;  %v5046_v4 = vld [vmem:[%s7025_s1 + $0x24] ss:$16 sps:$4 sm:$0xff] (!%p240_p2)   ;;  %s4207_s21 = sshll.u32 (!%p240_p2), %s4202_s25, 4 }
   0x7   : > { %2229 = vmatpush1.bf16.msra.mxu0 (!%p240_p2), %v5044_v2  ;;  %2681 = vmatpush1.bf16.msra.mxu1 (!%p240_p2), %v5045_v3  ;;  %v5048_v5 = vld [vmem:[%s7025_s1 + $0x2c] ss:$16 sps:$4 sm:$0xff] (!%p240_p2)   ;;  %v5050_v6 = vld [vmem:[%s7025_s1 + $0x20] ss:$16 sps:$4 sm:$0xff] (!%p240_p2)   ;;  %v5051_v7 = vld [vmem:[%s7025_s1 + $0x28] ss:$16 sps:$4 sm:$0xff] (!%p240_p2)  }
   0x8   : > { %2230 = vmatprep.subr.bf16.mxu0 (!%p240_p2), %v5046_v4  ;;  %2682 = vmatprep.subr.bf16.mxu1 (!%p240_p2), %v5048_v5  ;;  %v5052_v8 = vld [vmem:[%s7025_s1 + $0x44] ss:$16 sps:$4 sm:$0xff] (!%p240_p2)   ;;  %v5054_v9 = vld [vmem:[%s7025_s1 + $0x4c] ss:$16 sps:$4 sm:$0xff] (!%p240_p2)   ;;  %v5056_v10 = vld [vmem:[%s7025_s1 + $0x40] ss:$16 sps:$4 sm:$0xff] (!%p240_p2)  }
   0x9   : > { %v5057_v11 = vld [vmem:[%s7025_s1 + $0x48] ss:$16 sps:$4 sm:$0xff] (!%p240_p2)   ;;  %v5058_v12 = vld [vmem:[%s7025_s1 + $0x64] ss:$16 sps:$4 sm:$0xff] (!%p240_p2)   ;;  %v5060_v13 = vld [vmem:[%s7025_s1 + $0x6c] ss:$16 sps:$4 sm:$0xff] (!%p240_p2)  }
   0xa   : > { %v5062_v14 = vld [vmem:[%s7025_s1 + $0x60] ss:$16 sps:$4 sm:$0xff] (!%p240_p2)   ;;  %v5063_v15 = vld [vmem:[%s7025_s1 + $0x68] ss:$16 sps:$4 sm:$0xff] (!%p240_p2)   ;;  %v5064_v16 = vld [vmem:[%s7025_s1 + $0x84] ss:$16 sps:$4 sm:$0xff] (!%p240_p2)  }
   0xb   : > { %2231 = vmatpush1.bf16.msra.mxu0 (!%p240_p2), %v5050_v6  ;;  %2683 = vmatpush1.bf16.msra.mxu1 (!%p240_p2), %v5051_v7  ;;  %v5066_v17 = vld [vmem:[%s7025_s1 + $0x8c] ss:$16 sps:$4 sm:$0xff] (!%p240_p2)   ;;  %v5068_v18 = vld [vmem:[%s7025_s1 + $0x80] ss:$16 sps:$4 sm:$0xff] (!%p240_p2)   ;;  %v5069_v19 = vld [vmem:[%s7025_s1 + $0x88] ss:$16 sps:$4 sm:$0xff] (!%p240_p2)  }
   0xc   : > { %2232 = vmatprep.subr.bf16.mxu0 (!%p240_p2), %v5052_v8  ;;  %2684 = vmatprep.subr.bf16.mxu1 (!%p240_p2), %v5054_v9  ;;  %v5070_v20 = vld [vmem:[%s7025_s1 + $0xa4] ss:$16 sps:$4 sm:$0xff] (!%p240_p2)   ;;  %v5072_v21 = vld [vmem:[%s7025_s1 + $0xac] ss:$16 sps:$4 sm:$0xff] (!%p240_p2)   ;;  %v5074_v22 = vld [vmem:[%s7025_s1 + $0xa0] ss:$16 sps:$4 sm:$0xff] (!%p240_p2)  }
   0xd   : > { %v5075_v23 = vld [vmem:[%s7025_s1 + $0xa8] ss:$16 sps:$4 sm:$0xff]   ;;  %v5076_v24 = vld [vmem:[%s7025_s1 + $0xc4] ss:$16 sps:$4 sm:$0xff]   ;;  %v5078_v25 = vld [vmem:[%s7025_s1 + $0xcc] ss:$16 sps:$4 sm:$0xff]  }
   0xe   : > { %v5080_v26 = vld [vmem:[%s7025_s1 + $0xc0] ss:$16 sps:$4 sm:$0xff]   ;;  %v5081_v27 = vld [vmem:[%s7025_s1 + $0xc8] ss:$16 sps:$4 sm:$0xff]   ;;  %v5082_v28 = vld [vmem:[%s7025_s1 + $0xe4] ss:$16 sps:$4 sm:$0xff]  }
   0xf   : > { %2233 = vmatpush1.bf16.msra.mxu0 %v5056_v10  ;;  %2685 = vmatpush1.bf16.msra.mxu1 %v5057_v11  ;;  %v5084_v29 = vld [vmem:[%s7025_s1 + $0xec] ss:$16 sps:$4 sm:$0xff]   ;;  %v5086_v30 = vld [vmem:[%s7025_s1 + $0xe0] ss:$16 sps:$4 sm:$0xff]   ;;  %v5087_v31 = vld [vmem:[%s7025_s1 + $0xe8] ss:$16 sps:$4 sm:$0xff]  }
  0x10   : > { %2234 = vmatprep.subr.bf16.mxu0 %v5058_v12  ;;  %2686 = vmatprep.subr.bf16.mxu1 %v5060_v13  ;;  %v5088_v32 = vld [vmem:[%s7025_s1 + $0x104] ss:$16 sps:$4 sm:$0xff]   ;;  %p273_p3 = scmp.lt.s32.totalorder %s4207_s21, 31  ;;  %v5090_v33 = vld [vmem:[%s7025_s1 + $0x10c] ss:$16 sps:$4 sm:$0xff]  }
  0x11   : > { %v5092_v34 = vld [vmem:[%s7025_s1 + $0x100] ss:$16 sps:$4 sm:$0xff]   ;;  %v5093_v35 = vld [vmem:[%s7025_s1 + $0x108] ss:$16 sps:$4 sm:$0xff]   ;;  %v5094_v36 = vld [vmem:[%s7025_s1 + $0x124] ss:$16 sps:$4 sm:$0xff]  }
  0x12   : > { %s7033_s21 = smov (!%p273_p3, %s4207_s21), 31  ;;  %v5096_v37 = vld [vmem:[%s7025_s1 + $0x12c] ss:$16 sps:$4 sm:$0xff]   ;;  %v5098_v38 = vld [vmem:[%s7025_s1 + $0x120] ss:$16 sps:$4 sm:$0xff]  }
  0x13   : > { %2235 = vmatpush1.bf16.msra.mxu0 %v5062_v14  ;;  %2687 = vmatpush1.bf16.msra.mxu1 %v5063_v15  ;;  %v5099_v39 = vld [vmem:[%s7025_s1 + $0x128] ss:$16 sps:$4 sm:$0xff]   ;;  %v5100_v40 = vld [vmem:[%s7025_s1 + $0x144] ss:$16 sps:$4 sm:$0xff]   ;;  %s4615_s23 = sshll.u32 %s7033_s21, 5  ;;  %s4211_s14 = sshll.u32 %s7033_s21, 3 }
  0x14   : > { %2236 = vmatprep.subr.bf16.mxu0 %v5064_v16  ;;  %2688 = vmatprep.subr.bf16.mxu1 %v5066_v17  ;;  %v5102_v41 = vld [vmem:[%s7025_s1 + $0x14c] ss:$16 sps:$4 sm:$0xff]   ;;  %v5104_v42 = vld [vmem:[%s7025_s1 + $0x140] ss:$16 sps:$4 sm:$0xff]   ;;  %v5105_v43 = vld [vmem:[%s7025_s1 + $0x148] ss:$16 sps:$4 sm:$0xff]   ;;  %s5732_s10 = scalar_lea.vmem %s7024_s0, %s4615_s23  ;;  %s6987_s19 = scalar_lea.vmem %s7031_s7, %s4211_s14 }
  0x15   : > { %v5106_v44 = vld [vmem:[%s7025_s1 + $0x164] ss:$16 sps:$4 sm:$0xff]   ;;  %v5108_v45 = vld [vmem:[%s7025_s1 + $0x16c] ss:$16 sps:$4 sm:$0xff]   ;;  %v5110_v48 = vld [vmem:[%s7025_s1 + $0x160] ss:$16 sps:$4 sm:$0xff]  }
  0x16   : > { %v286_v46 = vld [vmem:[%s5732_s10] sm:$0xff]  ;;  %v5111_v49 = vld [vmem:[%s7025_s1 + $0x168] ss:$16 sps:$4 sm:$0xff]   ;;  %v5114_v52 = vld [vmem:[%s7025_s1 + $0x18c] ss:$16 sps:$4 sm:$0xff]  }
  0x17   : > { %2237 = vmatpush1.bf16.msra.mxu0 %v5068_v18  ;;  %2689 = vmatpush1.bf16.msra.mxu1 %v5069_v19  ;;  %v290_v47 = vld [vmem:[%s5732_s10 + $0x20] sm:$0xff]  ;;  %v5117_v54 = vld [vmem:[%s7025_s1 + $0x188] ss:$16 sps:$4 sm:$0xff]   ;;  %v5120_v56 = vld [vmem:[%s7025_s1 + $0x1ac] ss:$16 sps:$4 sm:$0xff]  }
  0x18   : > { %2238 = vmatprep.subr.bf16.mxu0 %v5070_v20  ;;  %2690 = vmatprep.subr.bf16.mxu1 %v5072_v21  ;;  %v4213_v50 = vcombine.high %v286_v46, %v290_v47  ;;  %v5112_v51 = vld [vmem:[%s7025_s1 + $0x184] ss:$16 sps:$4 sm:$0xff]   ;;  %v5116_v53 = vld [vmem:[%s7025_s1 + $0x180] ss:$16 sps:$4 sm:$0xff]   ;;  %v5123_v58 = vld [vmem:[%s7025_s1 + $0x1a8] ss:$16 sps:$4 sm:$0xff]   ;;  %v4212_v7 = vcombine.low %v286_v46, %v290_v47 }
  0x19   : > { %v5118_v55 = vld [vmem:[%s7025_s1 + $0x1a4] ss:$16 sps:$4 sm:$0xff]   ;;  %v5122_v57 = vld [vmem:[%s7025_s1 + $0x1a0] ss:$16 sps:$4 sm:$0xff]   ;;  %v5126_v60 = vld [vmem:[%s7025_s1 + $0x1cc] ss:$16 sps:$4 sm:$0xff]  }
  0x1a   : > { %2260 = vmatprep.mubr.bf16.mxu0 %v4213_v50  ;;  %2712 = vmatprep.mubr.bf16.mxu1 %v4213_v50  ;;  %v5124_v59 = vld [vmem:[%s7025_s1 + $0x1c4] ss:$16 sps:$4 sm:$0xff]   ;;  %v5128_v61 = vld [vmem:[%s7025_s1 + $0x1c0] ss:$16 sps:$4 sm:$0xff]   ;;  %v5129_v62 = vld [vmem:[%s7025_s1 + $0x1c8] ss:$16 sps:$4 sm:$0xff]  }
  0x1b   : > { %2239 = vmatpush1.bf16.msra.mxu0 %v5074_v22  ;;  %2691 = vmatpush1.bf16.msra.mxu1 %v5075_v23  ;;  %v5130_v63 = vld [vmem:[%s7025_s1 + $0x1e4] ss:$16 sps:$4 sm:$0xff]   ;;  %v5132_v0 = vld [vmem:[%s7025_s1 + $0x1ec] ss:$16 sps:$4 sm:$0xff]   ;;  %v5134_v1 = vld [vmem:[%s7025_s1 + $0x1e0] ss:$16 sps:$4 sm:$0xff]  }
  0x1c   : > { %2240 = vmatprep.subr.bf16.mxu0 %v5076_v24  ;;  %2692 = vmatprep.subr.bf16.mxu1 %v5078_v25  ;;  %v5135_v2 = vld [vmem:[%s7025_s1 + $0x1e8] ss:$16 sps:$4 sm:$0xff]   ;;  %v5138_v3 = vld [vmem:[%s7025_s1 + $0x204] ss:$16 sps:$4 sm:$0xff]   ;;  %v5141_v4 = vld [vmem:[%s7025_s1 + $0x20c] ss:$16 sps:$4 sm:$0xff]  }
  0x1d   : > { %v5136_v5 = vld [vmem:[%s7025_s1 + $0x200] ss:$16 sps:$4 sm:$0xff]   ;;  %v5139_v6 = vld [vmem:[%s7025_s1 + $0x208] ss:$16 sps:$4 sm:$0xff]   ;;  %v5144_v10 = vld [vmem:[%s7025_s1 + $0x224] ss:$16 sps:$4 sm:$0xff]  }
  0x1e   : > { %v294_v8 = vld [vmem:[%s5732_s10 + $0x40] sm:$0xff]  ;;  %v5147_v11 = vld [vmem:[%s7025_s1 + $0x22c] ss:$16 sps:$4 sm:$0xff]   ;;  %v5145_v14 = vld [vmem:[%s7025_s1 + $0x228] ss:$16 sps:$4 sm:$0xff]  }
  0x1f   : > { %2241 = vmatpush1.bf16.msra.mxu0 %v5080_v26  ;;  %2693 = vmatpush1.bf16.msra.mxu1 %v5081_v27  ;;  %v298_v9 = vld [vmem:[%s5732_s10 + $0x60] sm:$0xff]  ;;  %v5153_v16 = vld [vmem:[%s7025_s1 + $0x24c] ss:$16 sps:$4 sm:$0xff]   ;;  %v5151_v21 = vld [vmem:[%s7025_s1 + $0x248] ss:$16 sps:$4 sm:$0xff]  }
  0x20   : > { %2242 = vmatprep.subr.bf16.mxu0 %v5082_v28  ;;  %2694 = vmatprep.subr.bf16.mxu1 %v5084_v29  ;;  %v4221_v12 = vcombine.high %v294_v8, %v298_v9  ;;  %v5142_v13 = vld [vmem:[%s7025_s1 + $0x220] ss:$16 sps:$4 sm:$0xff]   ;;  %v5150_v15 = vld [vmem:[%s7025_s1 + $0x244] ss:$16 sps:$4 sm:$0xff]   ;;  %v4220_v18 = vcombine.low %v294_v8, %v298_v9  ;;  %v5159_v23 = vld [vmem:[%s7025_s1 + $0x26c] ss:$16 sps:$4 sm:$0xff]  }
  0x21   : > { %v302_v17 = vld [vmem:[%s5732_s10 + $0x80] sm:$0xff]  ;;  %v5157_v26 = vld [vmem:[%s7025_s1 + $0x268] ss:$16 sps:$4 sm:$0xff]   ;;  %v5165_v28 = vld [vmem:[%s7025_s1 + $0x28c] ss:$16 sps:$4 sm:$0xff]  }
  0x22   : > { %v306_v19 = vld [vmem:[%s5732_s10 + $0xa0] sm:$0xff]  ;;  %v5183_v47 = vld [vmem:[%s7025_s1 + $0x2ec] ss:$16 sps:$4 sm:$0xff]   ;;  %v5181_v50 = vld [vmem:[%s7025_s1 + $0x2e8] ss:$16 sps:$4 sm:$0xff]  }
  0x23   : > { %2243 = vmatpush1.bf16.msra.mxu0 %v5086_v30  ;;  %2695 = vmatpush1.bf16.msra.mxu1 %v5087_v31  ;;  %v5148_v20 = vld [vmem:[%s7025_s1 + $0x240] ss:$16 sps:$4 sm:$0xff]   ;;  %v5156_v22 = vld [vmem:[%s7025_s1 + $0x264] ss:$16 sps:$4 sm:$0xff]   ;;  %v4229_v24 = vcombine.high %v302_v17, %v306_v19  ;;  %v4228_v30 = vcombine.low %v302_v17, %v306_v19  ;;  %v5219_v19 = vld [vmem:[%s7025_s1 + $0x3ac] ss:$16 sps:$4 sm:$0xff]  }
  0x24   : > { %2244 = vmatprep.subr.bf16.mxu0 %v5088_v32  ;;  %2696 = vmatprep.subr.bf16.mxu1 %v5090_v33  ;;  %v5154_v25 = vld [vmem:[%s7025_s1 + $0x260] ss:$16 sps:$4 sm:$0xff]   ;;  %v5162_v27 = vld [vmem:[%s7025_s1 + $0x284] ss:$16 sps:$4 sm:$0xff]   ;;  %v5163_v33 = vld [vmem:[%s7025_s1 + $0x288] ss:$16 sps:$4 sm:$0xff]  }
  0x25   : > { %v310_v29 = vld [vmem:[%s5732_s10 + $0xc0] sm:$0xff] }
  0x26   : > { %v314_v31 = vld [vmem:[%s5732_s10 + $0xe0] sm:$0xff] }
  0x27   : > { %2245 = vmatpush1.bf16.msra.mxu0 %v5092_v34  ;;  %2697 = vmatpush1.bf16.msra.mxu1 %v5093_v35  ;;  %v5160_v32 = vld [vmem:[%s7025_s1 + $0x280] ss:$16 sps:$4 sm:$0xff]   ;;  %v5168_v34 = vld [vmem:[%s7025_s1 + $0x2a4] ss:$16 sps:$4 sm:$0xff]   ;;  %v5171_v35 = vld [vmem:[%s7025_s1 + $0x2ac] ss:$16 sps:$4 sm:$0xff]  }
  0x28   : > { %2246 = vmatprep.subr.bf16.mxu0 %v5094_v36  ;;  %2698 = vmatprep.subr.bf16.mxu1 %v5096_v37  ;;  %v4237_v36 = vcombine.high %v310_v29, %v314_v31  ;;  %v5166_v37 = vld [vmem:[%s7025_s1 + $0x2a0] ss:$16 sps:$4 sm:$0xff]   ;;  %v5180_v46 = vld [vmem:[%s7025_s1 + $0x2e4] ss:$16 sps:$4 sm:$0xff]  }
  0x29   : > { %v5202_v9 = vld [vmem:[%s7025_s1 + $0x360] ss:$16 sps:$4 sm:$0xff]  }
  0x2a   : > { %v346_v17 = vld [vmem:[%s5732_s10 + $0x1e0] sm:$0xff] }
  0x2b   : > { %2247 = vmatpush1.bf16.msra.mxu0 %v5098_v38  ;;  %2699 = vmatpush1.bf16.msra.mxu1 %v5099_v39  ;;  %v5169_v38 = vld [vmem:[%s7025_s1 + $0x2a8] ss:$16 sps:$4 sm:$0xff]   ;;  %v5174_v39 = vld [vmem:[%s7025_s1 + $0x2c4] ss:$16 sps:$4 sm:$0xff]  }
  0x2c   : > { %2248 = vmatprep.subr.bf16.mxu0 %v5100_v40  ;;  %2700 = vmatprep.subr.bf16.mxu1 %v5102_v41  ;;  %v5177_v40 = vld [vmem:[%s7025_s1 + $0x2cc] ss:$16 sps:$4 sm:$0xff]   ;;  %v5172_v41 = vld [vmem:[%s7025_s1 + $0x2c0] ss:$16 sps:$4 sm:$0xff]  }
  0x2f   : > { %2249 = vmatpush1.bf16.msra.mxu0 %v5104_v42  ;;  %2701 = vmatpush1.bf16.msra.mxu1 %v5105_v43  ;;  %v5175_v42 = vld [vmem:[%s7025_s1 + $0x2c8] ss:$16 sps:$4 sm:$0xff]   ;;  %v4236_v43 = vcombine.low %v310_v29, %v314_v31  ;;  %v5231_v31 = vld [vmem:[%s7025_s1 + $0x3ec] ss:$16 sps:$4 sm:$0xff]  }
  0x30   : > { %2250 = vmatprep.subr.bf16.mxu0 %v5106_v44  ;;  %2702 = vmatprep.subr.bf16.mxu1 %v5108_v45  ;;  %v318_v44 = vld [vmem:[%s5732_s10 + $0x100] sm:$0xff]  ;;  %v5223_v29 = vld [vmem:[%s7025_s1 + $0x3c8] ss:$16 sps:$4 sm:$0xff]  }
  0x31   : > { %v322_v45 = vld [vmem:[%s5732_s10 + $0x120] sm:$0xff] }
  0x33   : > { %2251 = vmatpush1.bf16.msra.mxu0 %v5110_v48  ;;  %2703 = vmatpush1.bf16.msra.mxu1 %v5111_v49  ;;  %v4245_v48 = vcombine.high %v318_v44, %v322_v45  ;;  %v5178_v49 = vld [vmem:[%s7025_s1 + $0x2e0] ss:$16 sps:$4 sm:$0xff]  }
  0x34   : > { %2252 = vmatprep.subr.bf16.mxu0 %v5112_v51  ;;  %2704 = vmatprep.subr.bf16.mxu1 %v5114_v52  ;;  %v5186_v51 = vld [vmem:[%s7025_s1 + $0x304] ss:$16 sps:$4 sm:$0xff]   ;;  %v5189_v52 = vld [vmem:[%s7025_s1 + $0x30c] ss:$16 sps:$4 sm:$0xff]  }
  0x37   : > { %2253 = vmatpush1.bf16.msra.mxu0 %v5116_v53  ;;  %2705 = vmatpush1.bf16.msra.mxu1 %v5117_v54  ;;  %v326_v53 = vld [vmem:[%s5732_s10 + $0x140] sm:$0xff]  ;;  %v4244_v54 = vcombine.low %v318_v44, %v322_v45 }
  0x38   : > { %2254 = vmatprep.subr.bf16.mxu0 %v5118_v55  ;;  %2706 = vmatprep.subr.bf16.mxu1 %v5120_v56  ;;  %v330_v55 = vld [vmem:[%s5732_s10 + $0x160] sm:$0xff] }
  0x39   : > { %v5184_v56 = vld [vmem:[%s7025_s1 + $0x300] ss:$16 sps:$4 sm:$0xff]  }
  0x3a   : > { %v5238_v45 = vld [vmem:[%s7025_s1 + $0x420] ss:$16 sps:$4 sm:$0xff]  }
  0x3b   : > { %2255 = vmatpush1.bf16.msra.mxu0 %v5122_v57  ;;  %2707 = vmatpush1.bf16.msra.mxu1 %v5123_v58  ;;  %v5187_v57 = vld [vmem:[%s7025_s1 + $0x308] ss:$16 sps:$4 sm:$0xff]   ;;  %v5192_v58 = vld [vmem:[%s7025_s1 + $0x324] ss:$16 sps:$4 sm:$0xff]  }
  0x3c   : > { %2256 = vmatprep.subr.bf16.mxu0 %v5124_v59  ;;  %2708 = vmatprep.subr.bf16.mxu1 %v5126_v60  ;;  %v5195_v59 = vld [vmem:[%s7025_s1 + $0x32c] ss:$16 sps:$4 sm:$0xff]   ;;  %v4253_v60 = vcombine.high %v326_v53, %v330_v55 }
  0x3f   : > { %2257 = vmatpush1.bf16.msra.mxu0 %v5128_v61  ;;  %2709 = vmatpush1.bf16.msra.mxu1 %v5129_v62  ;;  %v5190_v61 = vld [vmem:[%s7025_s1 + $0x320] ss:$16 sps:$4 sm:$0xff]   ;;  %v5193_v62 = vld [vmem:[%s7025_s1 + $0x328] ss:$16 sps:$4 sm:$0xff]  }
  0x40   : > { %2258 = vmatprep.subr.bf16.mxu0 %v5130_v63  ;;  %2710 = vmatprep.subr.bf16.mxu1 %v5132_v0  ;;  %v5198_v63 = vld [vmem:[%s7025_s1 + $0x344] ss:$16 sps:$4 sm:$0xff]   ;;  %v5201_v0 = vld [vmem:[%s7025_s1 + $0x34c] ss:$16 sps:$4 sm:$0xff]  }
  0x43   : > { %2259 = vmatpush1.bf16.msra.mxu0 %v5134_v1  ;;  %2711 = vmatpush1.bf16.msra.mxu1 %v5135_v2  ;;  %v334_v1 = vld [vmem:[%s5732_s10 + $0x180] sm:$0xff]  ;;  %v4252_v2 = vcombine.low %v326_v53, %v330_v55  ;;  %v307_v53 = vld [vmem:[%s5732_s10 + $0xa8] sm:$0xff] }
  0x44   : > { %2341 = vmatprep.subr.bf16.mxu0 %v5138_v3  ;;  %2793 = vmatprep.subr.bf16.mxu1 %v5141_v4  ;;  %v338_v3 = vld [vmem:[%s5732_s10 + $0x1a0] sm:$0xff]  ;;  %v5255_v55 = vld [vmem:[%s7025_s1 + $0x46c] ss:$16 sps:$4 sm:$0xff]  }
  0x45   : > { %v5196_v4 = vld [vmem:[%s7025_s1 + $0x340] ss:$16 sps:$4 sm:$0xff]   ;;  %v4261_v8 = vcombine.high %v334_v1, %v338_v3 }
  0x46   : > { %2261 = vmatmul.mubr.bf16.vlgmr.msra.gmra.mrb[0].mxu0 %v4212_v7  ;;  %2713 = vmatmul.mubr.bf16.vlgmr.msra.gmra.mrb[0].mxu1 %v4212_v7  ;;  %v5207_v7 = vld [vmem:[%s7025_s1 + $0x36c] ss:$16 sps:$4 sm:$0xff]  }
  0x47   : > { %2342 = vmatpush1.bf16.msra.mxu0 %v5136_v5  ;;  %2794 = vmatpush1.bf16.msra.mxu1 %v5139_v6  ;;  %v5199_v5 = vld [vmem:[%s7025_s1 + $0x348] ss:$16 sps:$4 sm:$0xff]   ;;  %v5204_v6 = vld [vmem:[%s7025_s1 + $0x364] ss:$16 sps:$4 sm:$0xff]  }
  0x48   : > { %2343 = vmatprep.subr.bf16.mxu0 %v5144_v10  ;;  %2795 = vmatprep.subr.bf16.mxu1 %v5147_v11  ;;  %v5205_v10 = vld [vmem:[%s7025_s1 + $0x368] ss:$16 sps:$4 sm:$0xff]   ;;  %v5210_v11 = vld [vmem:[%s7025_s1 + $0x384] ss:$16 sps:$4 sm:$0xff]  }
  0x49   : > { %2270 = vmatprep.mubr.bf16.mxu0 %v4221_v12  ;;  %2722 = vmatprep.mubr.bf16.mxu1 %v4221_v12  ;;  %v5213_v12 = vld [vmem:[%s7025_s1 + $0x38c] ss:$16 sps:$4 sm:$0xff]  }
  0x4b   : > { %2344 = vmatpush1.bf16.msra.mxu0 %v5142_v13  ;;  %2796 = vmatpush1.bf16.msra.mxu1 %v5145_v14  ;;  %v5208_v13 = vld [vmem:[%s7025_s1 + $0x380] ss:$16 sps:$4 sm:$0xff]   ;;  %v5211_v14 = vld [vmem:[%s7025_s1 + $0x388] ss:$16 sps:$4 sm:$0xff]  }
  0x4c   : > { %2345 = vmatprep.subr.bf16.mxu0 %v5150_v15  ;;  %2797 = vmatprep.subr.bf16.mxu1 %v5153_v16  ;;  %v4260_v15 = vcombine.low %v334_v1, %v338_v3  ;;  %v342_v16 = vld [vmem:[%s5732_s10 + $0x1c0] sm:$0xff]  ;;  %v5259_v1 = vld [vmem:[%s7025_s1 + $0x488] ss:$16 sps:$4 sm:$0xff]   ;;  %v5267_v3 = vld [vmem:[%s7025_s1 + $0x4ac] ss:$16 sps:$4 sm:$0xff]  }
  0x4e   : > { %2271 = vmatmul.mubr.bf16.gmra.mrb[4].mxu0 %v4220_v18  ;;  %2723 = vmatmul.mubr.bf16.gmra.mrb[4].mxu1 %v4220_v18  ;;  %v5216_v18 = vld [vmem:[%s7025_s1 + $0x3a4] ss:$16 sps:$4 sm:$0xff]  }
  0x4f   : > { %2346 = vmatpush1.bf16.msra.mxu0 %v5148_v20  ;;  %2798 = vmatpush1.bf16.msra.mxu1 %v5151_v21  ;;  %v4269_v20 = vcombine.high %v342_v16, %v346_v17  ;;  %v5214_v21 = vld [vmem:[%s7025_s1 + $0x3a0] ss:$16 sps:$4 sm:$0xff]  }
  0x50   : > { %2347 = vmatprep.subr.bf16.mxu0 %v5156_v22  ;;  %2799 = vmatprep.subr.bf16.mxu1 %v5159_v23  ;;  %v5217_v22 = vld [vmem:[%s7025_s1 + $0x3a8] ss:$16 sps:$4 sm:$0xff]   ;;  %v5222_v23 = vld [vmem:[%s7025_s1 + $0x3c4] ss:$16 sps:$4 sm:$0xff]  }
  0x51   : > { %2280 = vmatprep.mubr.bf16.mxu0 %v4229_v24  ;;  %2732 = vmatprep.mubr.bf16.mxu1 %v4229_v24  ;;  %v5225_v24 = vld [vmem:[%s7025_s1 + $0x3cc] ss:$16 sps:$4 sm:$0xff]  }
  0x53   : > { %2348 = vmatpush1.bf16.msra.mxu0 %v5154_v25  ;;  %2800 = vmatpush1.bf16.msra.mxu1 %v5157_v26  ;;  %v287_v25 = vld [vmem:[%s5732_s10 + $0x8] sm:$0xff]  ;;  %v4268_v26 = vcombine.low %v342_v16, %v346_v17  ;;  %v5274_v17 = vld [vmem:[%s7025_s1 + $0x4e0] ss:$16 sps:$4 sm:$0xff]  }
  0x54   : > { %2349 = vmatprep.subr.bf16.mxu0 %v5162_v27  ;;  %2801 = vmatprep.subr.bf16.mxu1 %v5165_v28  ;;  %v291_v27 = vld [vmem:[%s5732_s10 + $0x28] sm:$0xff]  ;;  %v5220_v28 = vld [vmem:[%s7025_s1 + $0x3c0] ss:$16 sps:$4 sm:$0xff]  }
  0x56   : > { %2281 = vmatmul.mubr.bf16.gmra.mrb[8].mxu0 %v4228_v30  ;;  %2733 = vmatmul.mubr.bf16.gmra.mrb[8].mxu1 %v4228_v30  ;;  %v5228_v30 = vld [vmem:[%s7025_s1 + $0x3e4] ss:$16 sps:$4 sm:$0xff]  }
  0x57   : > { %2350 = vmatpush1.bf16.msra.mxu0 %v5160_v32  ;;  %2802 = vmatpush1.bf16.msra.mxu1 %v5163_v33  ;;  %v4215_v32 = vcombine.high %v287_v25, %v291_v27  ;;  %v5226_v33 = vld [vmem:[%s7025_s1 + $0x3e0] ss:$16 sps:$4 sm:$0xff]  }
  0x58   : > { %2351 = vmatprep.subr.bf16.mxu0 %v5168_v34  ;;  %2803 = vmatprep.subr.bf16.mxu1 %v5171_v35  ;;  %v5229_v34 = vld [vmem:[%s7025_s1 + $0x3e8] ss:$16 sps:$4 sm:$0xff]   ;;  %v5234_v35 = vld [vmem:[%s7025_s1 + $0x404] ss:$16 sps:$4 sm:$0xff]  }
  0x59   : > { %2290 = vmatprep.mubr.bf16.mxu0 %v4237_v36  ;;  %2742 = vmatprep.mubr.bf16.mxu1 %v4237_v36  ;;  %v5237_v36 = vld [vmem:[%s7025_s1 + $0x40c] ss:$16 sps:$4 sm:$0xff]  }
  0x5b   : > { %2352 = vmatpush1.bf16.msra.mxu0 %v5166_v37  ;;  %2804 = vmatpush1.bf16.msra.mxu1 %v5169_v38  ;;  %v295_v37 = vld [vmem:[%s5732_s10 + $0x48] sm:$0xff]  ;;  %v4214_v38 = vcombine.low %v287_v25, %v291_v27 }
  0x5c   : > { %2353 = vmatprep.subr.bf16.mxu0 %v5174_v39  ;;  %2805 = vmatprep.subr.bf16.mxu1 %v5177_v40  ;;  %v299_v39 = vld [vmem:[%s5732_s10 + $0x68] sm:$0xff]  ;;  %v5232_v40 = vld [vmem:[%s7025_s1 + $0x400] ss:$16 sps:$4 sm:$0xff]  }
  0x5d   : > { %v4223_v44 = vcombine.high %v295_v37, %v299_v39  ;;  %v331_v25 = vld [vmem:[%s5732_s10 + $0x168] sm:$0xff] }
  0x5e   : > { %2291 = vmatmul.mubr.bf16.gmra.mrb[12].mxu0 %v4236_v43  ;;  %2743 = vmatmul.mubr.bf16.gmra.mrb[12].mxu1 %v4236_v43  ;;  %v5243_v43 = vld [vmem:[%s7025_s1 + $0x42c] ss:$16 sps:$4 sm:$0xff]  }
  0x5f   : > { %2354 = vmatpush1.bf16.msra.mxu0 %v5172_v41  ;;  %2806 = vmatpush1.bf16.msra.mxu1 %v5175_v42  ;;  %v5235_v41 = vld [vmem:[%s7025_s1 + $0x408] ss:$16 sps:$4 sm:$0xff]   ;;  %v5240_v42 = vld [vmem:[%s7025_s1 + $0x424] ss:$16 sps:$4 sm:$0xff]   ;;  %v5291_v27 = vld [vmem:[%s7025_s1 + $0x52c] ss:$16 sps:$4 sm:$0xff]  }
  0x60   : > { %2355 = vmatprep.subr.bf16.mxu0 %v5180_v46  ;;  %2807 = vmatprep.subr.bf16.mxu1 %v5183_v47  ;;  %v5241_v46 = vld [vmem:[%s7025_s1 + $0x428] ss:$16 sps:$4 sm:$0xff]   ;;  %v5246_v47 = vld [vmem:[%s7025_s1 + $0x444] ss:$16 sps:$4 sm:$0xff]  }
  0x61   : > { %2300 = vmatprep.mubr.bf16.mxu0 %v4245_v48  ;;  %2752 = vmatprep.mubr.bf16.mxu1 %v4245_v48  ;;  %v5249_v48 = vld [vmem:[%s7025_s1 + $0x44c] ss:$16 sps:$4 sm:$0xff]  }
  0x63   : > { %2356 = vmatpush1.bf16.msra.mxu0 %v5178_v49  ;;  %2808 = vmatpush1.bf16.msra.mxu1 %v5181_v50  ;;  %v5244_v49 = vld [vmem:[%s7025_s1 + $0x440] ss:$16 sps:$4 sm:$0xff]   ;;  %v5247_v50 = vld [vmem:[%s7025_s1 + $0x448] ss:$16 sps:$4 sm:$0xff]  }
  0x64   : > { %2357 = vmatprep.subr.bf16.mxu0 %v5186_v51  ;;  %2809 = vmatprep.subr.bf16.mxu1 %v5189_v52  ;;  %v4222_v51 = vcombine.low %v295_v37, %v299_v39  ;;  %v303_v52 = vld [vmem:[%s5732_s10 + $0x88] sm:$0xff] }
  0x65   : > { %v5295_v37 = vld [vmem:[%s7025_s1 + $0x548] ss:$16 sps:$4 sm:$0xff]   ;;  %v5303_v39 = vld [vmem:[%s7025_s1 + $0x56c] ss:$16 sps:$4 sm:$0xff]  }
  0x66   : > { %2301 = vmatmul.mubr.bf16.gmra.mrb[16].mxu0 %v4244_v54  ;;  %2753 = vmatmul.mubr.bf16.gmra.mrb[16].mxu1 %v4244_v54  ;;  %v5252_v54 = vld [vmem:[%s7025_s1 + $0x464] ss:$16 sps:$4 sm:$0xff]  }
  0x67   : > { %2358 = vmatpush1.bf16.msra.mxu0 %v5184_v56  ;;  %2810 = vmatpush1.bf16.msra.mxu1 %v5187_v57  ;;  %v4231_v56 = vcombine.high %v303_v52, %v307_v53  ;;  %v5250_v57 = vld [vmem:[%s7025_s1 + $0x460] ss:$16 sps:$4 sm:$0xff]  }
  0x68   : > { %2359 = vmatprep.subr.bf16.mxu0 %v5192_v58  ;;  %2811 = vmatprep.subr.bf16.mxu1 %v5195_v59  ;;  %v5253_v58 = vld [vmem:[%s7025_s1 + $0x468] ss:$16 sps:$4 sm:$0xff]   ;;  %v5258_v59 = vld [vmem:[%s7025_s1 + $0x484] ss:$16 sps:$4 sm:$0xff]  }
  0x69   : > { %2310 = vmatprep.mubr.bf16.mxu0 %v4253_v60  ;;  %2762 = vmatprep.mubr.bf16.mxu1 %v4253_v60  ;;  %v5261_v60 = vld [vmem:[%s7025_s1 + $0x48c] ss:$16 sps:$4 sm:$0xff]  }
  0x6b   : > { %2360 = vmatpush1.bf16.msra.mxu0 %v5190_v61  ;;  %2812 = vmatpush1.bf16.msra.mxu1 %v5193_v62  ;;  %v311_v61 = vld [vmem:[%s5732_s10 + $0xc8] sm:$0xff]  ;;  %v4230_v62 = vcombine.low %v303_v52, %v307_v53  ;;  %v5310_v53 = vld [vmem:[%s7025_s1 + $0x5a0] ss:$16 sps:$4 sm:$0xff]  }
  0x6c   : > { %2361 = vmatprep.subr.bf16.mxu0 %v5198_v63  ;;  %2813 = vmatprep.subr.bf16.mxu1 %v5201_v0  ;;  %v315_v63 = vld [vmem:[%s5732_s10 + $0xe8] sm:$0xff]  ;;  %v5256_v0 = vld [vmem:[%s7025_s1 + $0x480] ss:$16 sps:$4 sm:$0xff]  }
  0x6e   : > { %2311 = vmatmul.mubr.bf16.gmra.mrb[20].mxu0 %v4252_v2  ;;  %2763 = vmatmul.mubr.bf16.gmra.mrb[20].mxu1 %v4252_v2  ;;  %v5264_v2 = vld [vmem:[%s7025_s1 + $0x4a4] ss:$16 sps:$4 sm:$0xff]  }
  0x6f   : > { %2362 = vmatpush1.bf16.msra.mxu0 %v5196_v4  ;;  %2814 = vmatpush1.bf16.msra.mxu1 %v5199_v5  ;;  %v4239_v4 = vcombine.high %v311_v61, %v315_v63  ;;  %v5262_v5 = vld [vmem:[%s7025_s1 + $0x4a0] ss:$16 sps:$4 sm:$0xff]  }
  0x70   : > { %2363 = vmatprep.subr.bf16.mxu0 %v5204_v6  ;;  %2815 = vmatprep.subr.bf16.mxu1 %v5207_v7  ;;  %v5265_v6 = vld [vmem:[%s7025_s1 + $0x4a8] ss:$16 sps:$4 sm:$0xff]   ;;  %v5270_v7 = vld [vmem:[%s7025_s1 + $0x4c4] ss:$16 sps:$4 sm:$0xff]  }
  0x71   : > { %2320 = vmatprep.mubr.bf16.mxu0 %v4261_v8  ;;  %2772 = vmatprep.mubr.bf16.mxu1 %v4261_v8  ;;  %v5273_v8 = vld [vmem:[%s7025_s1 + $0x4cc] ss:$16 sps:$4 sm:$0xff]  }
  0x73   : > { %2364 = vmatpush1.bf16.msra.mxu0 %v5202_v9  ;;  %2816 = vmatpush1.bf16.msra.mxu1 %v5205_v10  ;;  %v319_v9 = vld [vmem:[%s5732_s10 + $0x108] sm:$0xff]  ;;  %v4238_v10 = vcombine.low %v311_v61, %v315_v63  ;;  %v292_v61 = vld [vmem:[%s5732_s10 + $0x30] sm:$0xff] }
  0x74   : > { %2365 = vmatprep.subr.bf16.mxu0 %v5210_v11  ;;  %2817 = vmatprep.subr.bf16.mxu1 %v5213_v12  ;;  %v323_v11 = vld [vmem:[%s5732_s10 + $0x128] sm:$0xff]  ;;  %v5268_v12 = vld [vmem:[%s7025_s1 + $0x4c0] ss:$16 sps:$4 sm:$0xff]  }
  0x75   : > { %v4247_v16 = vcombine.high %v319_v9, %v323_v11  ;;  %v5327_v63 = vld [vmem:[%s7025_s1 + $0x5ec] ss:$16 sps:$4 sm:$0xff]  }
  0x76   : > { %2321 = vmatmul.mubr.bf16.gmra.mrb[24].mxu0 %v4260_v15  ;;  %2773 = vmatmul.mubr.bf16.gmra.mrb[24].mxu1 %v4260_v15  ;;  %v5279_v15 = vld [vmem:[%s7025_s1 + $0x4ec] ss:$16 sps:$4 sm:$0xff]  }
  0x77   : > { %2366 = vmatpush1.bf16.msra.mxu0 %v5208_v13  ;;  %2818 = vmatpush1.bf16.msra.mxu1 %v5211_v14  ;;  %v5271_v13 = vld [vmem:[%s7025_s1 + $0x4c8] ss:$16 sps:$4 sm:$0xff]   ;;  %v5276_v14 = vld [vmem:[%s7025_s1 + $0x4e4] ss:$16 sps:$4 sm:$0xff]  }
  0x78   : > { %2367 = vmatprep.subr.bf16.mxu0 %v5216_v18  ;;  %2819 = vmatprep.subr.bf16.mxu1 %v5219_v19  ;;  %v5277_v18 = vld [vmem:[%s7025_s1 + $0x4e8] ss:$16 sps:$4 sm:$0xff]   ;;  %v5282_v19 = vld [vmem:[%s7025_s1 + $0x504] ss:$16 sps:$4 sm:$0xff]  }
  0x79   : > { %2330 = vmatprep.mubr.bf16.mxu0 %v4269_v20  ;;  %2782 = vmatprep.mubr.bf16.mxu1 %v4269_v20  ;;  %v5285_v20 = vld [vmem:[%s7025_s1 + $0x50c] ss:$16 sps:$4 sm:$0xff]  }
  0x7b   : > { %2368 = vmatpush1.bf16.msra.mxu0 %v5214_v21  ;;  %2820 = vmatpush1.bf16.msra.mxu1 %v5217_v22  ;;  %v5280_v21 = vld [vmem:[%s7025_s1 + $0x500] ss:$16 sps:$4 sm:$0xff]   ;;  %v5283_v22 = vld [vmem:[%s7025_s1 + $0x508] ss:$16 sps:$4 sm:$0xff]  }
  0x7c   : > { %2369 = vmatprep.subr.bf16.mxu0 %v5222_v23  ;;  %2821 = vmatprep.subr.bf16.mxu1 %v5225_v24  ;;  %v4246_v23 = vcombine.low %v319_v9, %v323_v11  ;;  %v327_v24 = vld [vmem:[%s5732_s10 + $0x148] sm:$0xff]  ;;  %v300_v9 = vld [vmem:[%s5732_s10 + $0x70] sm:$0xff] }
  0x7d   : > { %v5339_v11 = vld [vmem:[%s7025_s1 + $0x62c] ss:$16 sps:$4 sm:$0xff]  }
  0x7e   : > { %2331 = vmatmul.mubr.bf16.gmra.mrb[28].mxu0 %v4268_v26  ;;  %2783 = vmatmul.mubr.bf16.gmra.mrb[28].mxu1 %v4268_v26  ;;  %v5288_v26 = vld [vmem:[%s7025_s1 + $0x524] ss:$16 sps:$4 sm:$0xff]  }
  0x7f   : > { %2370 = vmatpush1.bf16.msra.mxu0 %v5220_v28  ;;  %2822 = vmatpush1.bf16.msra.mxu1 %v5223_v29  ;;  %v4255_v28 = vcombine.high %v327_v24, %v331_v25  ;;  %v5286_v29 = vld [vmem:[%s7025_s1 + $0x520] ss:$16 sps:$4 sm:$0xff]  }
  0x80   : > { %2371 = vmatprep.subr.bf16.mxu0 %v5228_v30  ;;  %2823 = vmatprep.subr.bf16.mxu1 %v5231_v31  ;;  %v5289_v30 = vld [vmem:[%s7025_s1 + $0x528] ss:$16 sps:$4 sm:$0xff]   ;;  %v5294_v31 = vld [vmem:[%s7025_s1 + $0x544] ss:$16 sps:$4 sm:$0xff]  }
  0x81   : > { %2373 = vmatprep.mubr.bf16.mxu0 %v4215_v32  ;;  %2825 = vmatprep.mubr.bf16.mxu1 %v4215_v32  ;;  %v5297_v32 = vld [vmem:[%s7025_s1 + $0x54c] ss:$16 sps:$4 sm:$0xff]  }
  0x83   : > { %2372 = vmatpush1.bf16.msra.mxu0 %v5226_v33  ;;  %2824 = vmatpush1.bf16.msra.mxu1 %v5229_v34  ;;  %v335_v33 = vld [vmem:[%s5732_s10 + $0x188] sm:$0xff]  ;;  %v4254_v34 = vcombine.low %v327_v24, %v331_v25  ;;  %v5346_v25 = vld [vmem:[%s7025_s1 + $0x660] ss:$16 sps:$4 sm:$0xff]  }
  0x84   : > { %2454 = vmatprep.subr.bf16.mxu0 %v5234_v35  ;;  %2906 = vmatprep.subr.bf16.mxu1 %v5237_v36  ;;  %v339_v35 = vld [vmem:[%s5732_s10 + $0x1a8] sm:$0xff]  ;;  %v5292_v36 = vld [vmem:[%s7025_s1 + $0x540] ss:$16 sps:$4 sm:$0xff]  }
  0x86   : > { %2374 = vmatmul.mubr.bf16.vlgmr.msra.gmra.mrb[0].mxu0 %v4214_v38  ;;  %2826 = vmatmul.mubr.bf16.vlgmr.msra.gmra.mrb[0].mxu1 %v4214_v38  ;;  %v5300_v38 = vld [vmem:[%s7025_s1 + $0x564] ss:$16 sps:$4 sm:$0xff]  }
  0x87   : > { %2455 = vmatpush1.bf16.msra.mxu0 %v5232_v40  ;;  %2907 = vmatpush1.bf16.msra.mxu1 %v5235_v41  ;;  %v4263_v40 = vcombine.high %v335_v33, %v339_v35  ;;  %v5298_v41 = vld [vmem:[%s7025_s1 + $0x560] ss:$16 sps:$4 sm:$0xff]  }
  0x88   : > { %2456 = vmatprep.subr.bf16.mxu0 %v5240_v42  ;;  %2908 = vmatprep.subr.bf16.mxu1 %v5243_v43  ;;  %v5301_v42 = vld [vmem:[%s7025_s1 + $0x568] ss:$16 sps:$4 sm:$0xff]   ;;  %v5306_v43 = vld [vmem:[%s7025_s1 + $0x584] ss:$16 sps:$4 sm:$0xff]  }
  0x89   : > { %2383 = vmatprep.mubr.bf16.mxu0 %v4223_v44  ;;  %2835 = vmatprep.mubr.bf16.mxu1 %v4223_v44  ;;  %v5309_v44 = vld [vmem:[%s7025_s1 + $0x58c] ss:$16 sps:$4 sm:$0xff]  }
  0x8b   : > { %2457 = vmatpush1.bf16.msra.mxu0 %v5238_v45  ;;  %2909 = vmatpush1.bf16.msra.mxu1 %v5241_v46  ;;  %v343_v45 = vld [vmem:[%s5732_s10 + $0x1c8] sm:$0xff]  ;;  %v4262_v46 = vcombine.low %v335_v33, %v339_v35  ;;  %v316_v33 = vld [vmem:[%s5732_s10 + $0xf0] sm:$0xff] }
  0x8c   : > { %2458 = vmatprep.subr.bf16.mxu0 %v5246_v47  ;;  %2910 = vmatprep.subr.bf16.mxu1 %v5249_v48  ;;  %v347_v47 = vld [vmem:[%s5732_s10 + $0x1e8] sm:$0xff]  ;;  %v5304_v48 = vld [vmem:[%s7025_s1 + $0x580] ss:$16 sps:$4 sm:$0xff]  }
  0x8d   : > { %v4271_v52 = vcombine.high %v343_v45, %v347_v47  ;;  %v5363_v35 = vld [vmem:[%s7025_s1 + $0x6ac] ss:$16 sps:$4 sm:$0xff]  }
  0x8e   : > { %2384 = vmatmul.mubr.bf16.gmra.mrb[4].mxu0 %v4222_v51  ;;  %2836 = vmatmul.mubr.bf16.gmra.mrb[4].mxu1 %v4222_v51  ;;  %v5315_v51 = vld [vmem:[%s7025_s1 + $0x5ac] ss:$16 sps:$4 sm:$0xff]  }
  0x8f   : > { %2459 = vmatpush1.bf16.msra.mxu0 %v5244_v49  ;;  %2911 = vmatpush1.bf16.msra.mxu1 %v5247_v50  ;;  %v5307_v49 = vld [vmem:[%s7025_s1 + $0x588] ss:$16 sps:$4 sm:$0xff]   ;;  %v5312_v50 = vld [vmem:[%s7025_s1 + $0x5a4] ss:$16 sps:$4 sm:$0xff]  }
  0x90   : > { %2460 = vmatprep.subr.bf16.mxu0 %v5252_v54  ;;  %2912 = vmatprep.subr.bf16.mxu1 %v5255_v55  ;;  %v5313_v54 = vld [vmem:[%s7025_s1 + $0x5a8] ss:$16 sps:$4 sm:$0xff]   ;;  %v5318_v55 = vld [vmem:[%s7025_s1 + $0x5c4] ss:$16 sps:$4 sm:$0xff]  }
  0x91   : > { %2393 = vmatprep.mubr.bf16.mxu0 %v4231_v56  ;;  %2845 = vmatprep.mubr.bf16.mxu1 %v4231_v56  ;;  %v5321_v56 = vld [vmem:[%s7025_s1 + $0x5cc] ss:$16 sps:$4 sm:$0xff]  }
  0x93   : > { %2461 = vmatpush1.bf16.msra.mxu0 %v5250_v57  ;;  %2913 = vmatpush1.bf16.msra.mxu1 %v5253_v58  ;;  %v5316_v57 = vld [vmem:[%s7025_s1 + $0x5c0] ss:$16 sps:$4 sm:$0xff]   ;;  %v5319_v58 = vld [vmem:[%s7025_s1 + $0x5c8] ss:$16 sps:$4 sm:$0xff]  }
  0x94   : > { %2462 = vmatprep.subr.bf16.mxu0 %v5258_v59  ;;  %2914 = vmatprep.subr.bf16.mxu1 %v5261_v60  ;;  %v4270_v59 = vcombine.low %v343_v45, %v347_v47  ;;  %v288_v60 = vld [vmem:[%s5732_s10 + $0x10] sm:$0xff]  ;;  %v5375_v47 = vld [vmem:[%s7025_s1 + $0x6ec] ss:$16 sps:$4 sm:$0xff]  }
  0x95   : > { %v324_v45 = vld [vmem:[%s5732_s10 + $0x130] sm:$0xff] }
  0x96   : > { %2394 = vmatmul.mubr.bf16.gmra.mrb[8].mxu0 %v4230_v62  ;;  %2846 = vmatmul.mubr.bf16.gmra.mrb[8].mxu1 %v4230_v62  ;;  %v5324_v62 = vld [vmem:[%s7025_s1 + $0x5e4] ss:$16 sps:$4 sm:$0xff]  }
  0x97   : > { %2463 = vmatpush1.bf16.msra.mxu0 %v5256_v0  ;;  %2915 = vmatpush1.bf16.msra.mxu1 %v5259_v1  ;;  %v4217_v0 = vcombine.high %v288_v60, %v292_v61  ;;  %v5322_v1 = vld [vmem:[%s7025_s1 + $0x5e0] ss:$16 sps:$4 sm:$0xff]  }
  0x98   : > { %2464 = vmatprep.subr.bf16.mxu0 %v5264_v2  ;;  %2916 = vmatprep.subr.bf16.mxu1 %v5267_v3  ;;  %v5325_v2 = vld [vmem:[%s7025_s1 + $0x5e8] ss:$16 sps:$4 sm:$0xff]   ;;  %v5330_v3 = vld [vmem:[%s7025_s1 + $0x604] ss:$16 sps:$4 sm:$0xff]  }
  0x99   : > { %2403 = vmatprep.mubr.bf16.mxu0 %v4239_v4  ;;  %2855 = vmatprep.mubr.bf16.mxu1 %v4239_v4  ;;  %v5333_v4 = vld [vmem:[%s7025_s1 + $0x60c] ss:$16 sps:$4 sm:$0xff]  }
  0x9b   : > { %2465 = vmatpush1.bf16.msra.mxu0 %v5262_v5  ;;  %2917 = vmatpush1.bf16.msra.mxu1 %v5265_v6  ;;  %v5328_v5 = vld [vmem:[%s7025_s1 + $0x600] ss:$16 sps:$4 sm:$0xff]   ;;  %v4216_v6 = vcombine.low %v288_v60, %v292_v61  ;;  %v5385_v61 = vld [vmem:[%s7025_s1 + $0x728] ss:$16 sps:$4 sm:$0xff]  }
  0x9c   : > { %2466 = vmatprep.subr.bf16.mxu0 %v5270_v7  ;;  %2918 = vmatprep.subr.bf16.mxu1 %v5273_v8  ;;  %v5331_v7 = vld [vmem:[%s7025_s1 + $0x608] ss:$16 sps:$4 sm:$0xff]   ;;  %v296_v8 = vld [vmem:[%s5732_s10 + $0x50] sm:$0xff] }
  0x9d   : > { %v5382_v60 = vld [vmem:[%s7025_s1 + $0x720] ss:$16 sps:$4 sm:$0xff]  }
  0x9e   : > { %2404 = vmatmul.mubr.bf16.gmra.mrb[12].mxu0 %v4238_v10  ;;  %2856 = vmatmul.mubr.bf16.gmra.mrb[12].mxu1 %v4238_v10  ;;  %v5336_v10 = vld [vmem:[%s7025_s1 + $0x624] ss:$16 sps:$4 sm:$0xff]  }
  0x9f   : > { %2467 = vmatpush1.bf16.msra.mxu0 %v5268_v12  ;;  %2919 = vmatpush1.bf16.msra.mxu1 %v5271_v13  ;;  %v4225_v12 = vcombine.high %v296_v8, %v300_v9  ;;  %v5334_v13 = vld [vmem:[%s7025_s1 + $0x620] ss:$16 sps:$4 sm:$0xff]  }
  0xa0   : > { %2468 = vmatprep.subr.bf16.mxu0 %v5276_v14  ;;  %2920 = vmatprep.subr.bf16.mxu1 %v5279_v15  ;;  %v5337_v14 = vld [vmem:[%s7025_s1 + $0x628] ss:$16 sps:$4 sm:$0xff]   ;;  %v5342_v15 = vld [vmem:[%s7025_s1 + $0x644] ss:$16 sps:$4 sm:$0xff]  }
  0xa1   : > { %2413 = vmatprep.mubr.bf16.mxu0 %v4247_v16  ;;  %2865 = vmatprep.mubr.bf16.mxu1 %v4247_v16  ;;  %v5345_v16 = vld [vmem:[%s7025_s1 + $0x64c] ss:$16 sps:$4 sm:$0xff]  }
  0xa3   : > { %2469 = vmatpush1.bf16.msra.mxu0 %v5274_v17  ;;  %2921 = vmatpush1.bf16.msra.mxu1 %v5277_v18  ;;  %v5340_v17 = vld [vmem:[%s7025_s1 + $0x640] ss:$16 sps:$4 sm:$0xff]   ;;  %v5343_v18 = vld [vmem:[%s7025_s1 + $0x648] ss:$16 sps:$4 sm:$0xff]  }
  0xa4   : > { %2470 = vmatprep.subr.bf16.mxu0 %v5282_v19  ;;  %2922 = vmatprep.subr.bf16.mxu1 %v5285_v20  ;;  %v4224_v19 = vcombine.low %v296_v8, %v300_v9  ;;  %v304_v20 = vld [vmem:[%s5732_s10 + $0x90] sm:$0xff]  ;;  %v5397_v9 = vld [vmem:[%s7025_s1 + $0x768] ss:$16 sps:$4 sm:$0xff]  }
  0xa5   : > { %v5394_v8 = vld [vmem:[%s7025_s1 + $0x760] ss:$16 sps:$4 sm:$0xff]  }
  0xa6   : > { %2414 = vmatmul.mubr.bf16.gmra.mrb[16].mxu0 %v4246_v23  ;;  %2866 = vmatmul.mubr.bf16.gmra.mrb[16].mxu1 %v4246_v23  ;;  %v5351_v23 = vld [vmem:[%s7025_s1 + $0x66c] ss:$16 sps:$4 sm:$0xff]  }
  0xa7   : > { %2471 = vmatpush1.bf16.msra.mxu0 %v5280_v21  ;;  %2923 = vmatpush1.bf16.msra.mxu1 %v5283_v22  ;;  %v308_v21 = vld [vmem:[%s5732_s10 + $0xb0] sm:$0xff] }
  0xa8   : > { %2472 = vmatprep.subr.bf16.mxu0 %v5288_v26  ;;  %2924 = vmatprep.subr.bf16.mxu1 %v5291_v27  ;;  %v5348_v22 = vld [vmem:[%s7025_s1 + $0x664] ss:$16 sps:$4 sm:$0xff]   ;;  %v4233_v24 = vcombine.high %v304_v20, %v308_v21  ;;  %v5349_v26 = vld [vmem:[%s7025_s1 + $0x668] ss:$16 sps:$4 sm:$0xff]  }
  0xa9   : > { %2423 = vmatprep.mubr.bf16.mxu0 %v4255_v28  ;;  %2875 = vmatprep.mubr.bf16.mxu1 %v4255_v28  ;;  %v5354_v27 = vld [vmem:[%s7025_s1 + $0x684] ss:$16 sps:$4 sm:$0xff]   ;;  %v5357_v28 = vld [vmem:[%s7025_s1 + $0x68c] ss:$16 sps:$4 sm:$0xff]  }
  0xab   : > { %2473 = vmatpush1.bf16.msra.mxu0 %v5286_v29  ;;  %2925 = vmatpush1.bf16.msra.mxu1 %v5289_v30  ;;  %v5352_v29 = vld [vmem:[%s7025_s1 + $0x680] ss:$16 sps:$4 sm:$0xff]   ;;  %v5355_v30 = vld [vmem:[%s7025_s1 + $0x688] ss:$16 sps:$4 sm:$0xff]  }
  0xac   : > { %2474 = vmatprep.subr.bf16.mxu0 %v5294_v31  ;;  %2926 = vmatprep.subr.bf16.mxu1 %v5297_v32  ;;  %v4232_v31 = vcombine.low %v304_v20, %v308_v21  ;;  %v312_v32 = vld [vmem:[%s5732_s10 + $0xd0] sm:$0xff] }
  0xad   : > { %v5406_v21 = vld [vmem:[%s7025_s1 + $0x7a0] ss:$16 sps:$4 sm:$0xff]  }
  0xae   : > { %2424 = vmatmul.mubr.bf16.gmra.mrb[20].mxu0 %v4254_v34  ;;  %2876 = vmatmul.mubr.bf16.gmra.mrb[20].mxu1 %v4254_v34  ;;  %v5360_v34 = vld [vmem:[%s7025_s1 + $0x6a4] ss:$16 sps:$4 sm:$0xff]  }
  0xaf   : > { %2475 = vmatpush1.bf16.msra.mxu0 %v5292_v36  ;;  %2927 = vmatpush1.bf16.msra.mxu1 %v5295_v37  ;;  %v4241_v36 = vcombine.high %v312_v32, %v316_v33  ;;  %v5358_v37 = vld [vmem:[%s7025_s1 + $0x6a0] ss:$16 sps:$4 sm:$0xff]  }
  0xb0   : > { %2476 = vmatprep.subr.bf16.mxu0 %v5300_v38  ;;  %2928 = vmatprep.subr.bf16.mxu1 %v5303_v39  ;;  %v5361_v38 = vld [vmem:[%s7025_s1 + $0x6a8] ss:$16 sps:$4 sm:$0xff]   ;;  %v5366_v39 = vld [vmem:[%s7025_s1 + $0x6c4] ss:$16 sps:$4 sm:$0xff]  }
  0xb1   : > { %2433 = vmatprep.mubr.bf16.mxu0 %v4263_v40  ;;  %2885 = vmatprep.mubr.bf16.mxu1 %v4263_v40  ;;  %v5369_v40 = vld [vmem:[%s7025_s1 + $0x6cc] ss:$16 sps:$4 sm:$0xff]  }
  0xb3   : > { %2477 = vmatpush1.bf16.msra.mxu0 %v5298_v41  ;;  %2929 = vmatpush1.bf16.msra.mxu1 %v5301_v42  ;;  %v5364_v41 = vld [vmem:[%s7025_s1 + $0x6c0] ss:$16 sps:$4 sm:$0xff]   ;;  %v5367_v42 = vld [vmem:[%s7025_s1 + $0x6c8] ss:$16 sps:$4 sm:$0xff]  }
  0xb4   : > { %2478 = vmatprep.subr.bf16.mxu0 %v5306_v43  ;;  %2930 = vmatprep.subr.bf16.mxu1 %v5309_v44  ;;  %v4240_v43 = vcombine.low %v312_v32, %v316_v33  ;;  %v320_v44 = vld [vmem:[%s5732_s10 + $0x110] sm:$0xff] }
  0xb5   : > { %v5418_v33 = vld [vmem:[%s7025_s1 + $0x7e0] ss:$16 sps:$4 sm:$0xff]  }
  0xb6   : > { %2434 = vmatmul.mubr.bf16.gmra.mrb[24].mxu0 %v4262_v46  ;;  %2886 = vmatmul.mubr.bf16.gmra.mrb[24].mxu1 %v4262_v46  ;;  %v5372_v46 = vld [vmem:[%s7025_s1 + $0x6e4] ss:$16 sps:$4 sm:$0xff]  }
  0xb7   : > { %2479 = vmatpush1.bf16.msra.mxu0 %v5304_v48  ;;  %2931 = vmatpush1.bf16.msra.mxu1 %v5307_v49  ;;  %v5370_v48 = vld [vmem:[%s7025_s1 + $0x6e0] ss:$16 sps:$4 sm:$0xff]   ;;  %v5373_v49 = vld [vmem:[%s7025_s1 + $0x6e8] ss:$16 sps:$4 sm:$0xff]  }
  0xb8   : > { %2480 = vmatprep.subr.bf16.mxu0 %v5312_v50  ;;  %2932 = vmatprep.subr.bf16.mxu1 %v5315_v51  ;;  %v4249_v50 = vcombine.high %v320_v44, %v324_v45  ;;  %v5378_v51 = vld [vmem:[%s7025_s1 + $0x704] ss:$16 sps:$4 sm:$0xff]  }
  0xb9   : > { %2443 = vmatprep.mubr.bf16.mxu0 %v4271_v52  ;;  %2895 = vmatprep.mubr.bf16.mxu1 %v4271_v52  ;;  %v5381_v52 = vld [vmem:[%s7025_s1 + $0x70c] ss:$16 sps:$4 sm:$0xff]  }
  0xbb   : > { %2481 = vmatpush1.bf16.msra.mxu0 %v5310_v53  ;;  %2933 = vmatpush1.bf16.msra.mxu1 %v5313_v54  ;;  %v328_v53 = vld [vmem:[%s5732_s10 + $0x150] sm:$0xff] }
  0xbc   : > { %2482 = vmatprep.subr.bf16.mxu0 %v5318_v55  ;;  %2934 = vmatprep.subr.bf16.mxu1 %v5321_v56  ;;  %v332_v54 = vld [vmem:[%s5732_s10 + $0x170] sm:$0xff]  ;;  %v5379_v56 = vld [vmem:[%s7025_s1 + $0x708] ss:$16 sps:$4 sm:$0xff]  }
  0xbd   : > { %v5376_v55 = vld [vmem:[%s7025_s1 + $0x700] ss:$16 sps:$4 sm:$0xff]  }
  0xbe   : > { %2444 = vmatmul.mubr.bf16.gmra.mrb[28].mxu0 %v4270_v59  ;;  %2896 = vmatmul.mubr.bf16.gmra.mrb[28].mxu1 %v4270_v59  ;;  %v5387_v59 = vld [vmem:[%s7025_s1 + $0x72c] ss:$16 sps:$4 sm:$0xff]  }
  0xbf   : > { %2483 = vmatpush1.bf16.msra.mxu0 %v5316_v57  ;;  %2935 = vmatpush1.bf16.msra.mxu1 %v5319_v58  ;;  %v4248_v57 = vcombine.low %v320_v44, %v324_v45  ;;  %v5384_v58 = vld [vmem:[%s7025_s1 + $0x724] ss:$16 sps:$4 sm:$0xff]   ;;  %v305_v45 = vld [vmem:[%s5732_s10 + $0x98] sm:$0xff] }
  0xc0   : > { %2484 = vmatprep.subr.bf16.mxu0 %v5324_v62  ;;  %2936 = vmatprep.subr.bf16.mxu1 %v5327_v63  ;;  %v4257_v62 = vcombine.high %v328_v53, %v332_v54  ;;  %v5390_v63 = vld [vmem:[%s7025_s1 + $0x744] ss:$16 sps:$4 sm:$0xff]  }
  0xc1   : > { %2486 = vmatprep.mubr.bf16.mxu0 %v4217_v0  ;;  %2938 = vmatprep.mubr.bf16.mxu1 %v4217_v0  ;;  %v5393_v0 = vld [vmem:[%s7025_s1 + $0x74c] ss:$16 sps:$4 sm:$0xff]  }
  0xc2   : > { %v6445_v44 = vld [vmem:[%s7027_s3 + $0x114] ss:$8 sps:$4 sm:$0xff]  }
  0xc3   : > { %2485 = vmatpush1.bf16.msra.mxu0 %v5322_v1  ;;  %2937 = vmatpush1.bf16.msra.mxu1 %v5325_v2  ;;  %v336_v1 = vld [vmem:[%s5732_s10 + $0x190] sm:$0xff] }
  0xc4   : > { %2567 = vmatprep.subr.bf16.mxu0 %v5330_v3  ;;  %3019 = vmatprep.subr.bf16.mxu1 %v5333_v4  ;;  %v340_v2 = vld [vmem:[%s5732_s10 + $0x1b0] sm:$0xff]  ;;  %v5391_v4 = vld [vmem:[%s7025_s1 + $0x748] ss:$16 sps:$4 sm:$0xff]  }
  0xc5   : > { %v5388_v3 = vld [vmem:[%s7025_s1 + $0x740] ss:$16 sps:$4 sm:$0xff]  }
  0xc6   : > { %2487 = vmatmul.mubr.bf16.vlgmr.msra.gmra.mrb[0].mxu0 %v4216_v6  ;;  %2939 = vmatmul.mubr.bf16.vlgmr.msra.gmra.mrb[0].mxu1 %v4216_v6  ;;  %v5396_v6 = vld [vmem:[%s7025_s1 + $0x764] ss:$16 sps:$4 sm:$0xff]  }
  0xc7   : > { %2568 = vmatpush1.bf16.msra.mxu0 %v5328_v5  ;;  %3020 = vmatpush1.bf16.msra.mxu1 %v5331_v7  ;;  %v4256_v5 = vcombine.low %v328_v53, %v332_v54  ;;  %v5399_v7 = vld [vmem:[%s7025_s1 + $0x76c] ss:$16 sps:$4 sm:$0xff]   ;;  %v5430_v53 = vld [vmem:[%s7027_s3 + $0x20] ss:$8 sps:$4 sm:$0xff]  }
  0xc8   : > { %2569 = vmatprep.subr.bf16.mxu0 %v5336_v10  ;;  %3021 = vmatprep.subr.bf16.mxu1 %v5339_v11  ;;  %v4265_v10 = vcombine.high %v336_v1, %v340_v2  ;;  %v5402_v11 = vld [vmem:[%s7025_s1 + $0x784] ss:$16 sps:$4 sm:$0xff]   ;;  %v6474_v54 = vld [vmem:[%s7027_s3 + $0x120] ss:$8 sps:$4 sm:$0xff]  }
  0xc9   : > { %2496 = vmatprep.mubr.bf16.mxu0 %v4225_v12  ;;  %2948 = vmatprep.mubr.bf16.mxu1 %v4225_v12  ;;  %v5405_v12 = vld [vmem:[%s7025_s1 + $0x78c] ss:$16 sps:$4 sm:$0xff]  }
  0xcb   : > { %2570 = vmatpush1.bf16.msra.mxu0 %v5334_v13  ;;  %3022 = vmatpush1.bf16.msra.mxu1 %v5337_v14  ;;  %v4264_v13 = vcombine.low %v336_v1, %v340_v2  ;;  %v344_v14 = vld [vmem:[%s5732_s10 + $0x1d0] sm:$0xff]  ;;  %v5436_v1 = vld [vmem:[%s7027_s3 + $0x40] ss:$8 sps:$4 sm:$0xff]  }
  0xcc   : > { %2571 = vmatprep.subr.bf16.mxu0 %v5342_v15  ;;  %3023 = vmatprep.subr.bf16.mxu1 %v5345_v16  ;;  %v348_v15 = vld [vmem:[%s5732_s10 + $0x1f0] sm:$0xff]  ;;  %v6512_v2 = vld [vmem:[%s7027_s3 + $0x140] ss:$8 sps:$4 sm:$0xff]  }
  0xcd   : > { %v5400_v16 = vld [vmem:[%s7025_s1 + $0x780] ss:$16 sps:$4 sm:$0xff]   ;;  %v4273_v20 = vcombine.high %v344_v14, %v348_v15 }
  0xce   : > { %2497 = vmatmul.mubr.bf16.gmra.mrb[4].mxu0 %v4224_v19  ;;  %2949 = vmatmul.mubr.bf16.gmra.mrb[4].mxu1 %v4224_v19  ;;  %v5411_v19 = vld [vmem:[%s7025_s1 + $0x7ac] ss:$16 sps:$4 sm:$0xff]  }
  0xcf   : > { %2572 = vmatpush1.bf16.msra.mxu0 %v5340_v17  ;;  %3024 = vmatpush1.bf16.msra.mxu1 %v5343_v18  ;;  %v5403_v17 = vld [vmem:[%s7025_s1 + $0x788] ss:$16 sps:$4 sm:$0xff]   ;;  %v5408_v18 = vld [vmem:[%s7025_s1 + $0x7a4] ss:$16 sps:$4 sm:$0xff]  }
  0xd0   : > { %2573 = vmatprep.subr.bf16.mxu0 %v5348_v22  ;;  %3025 = vmatprep.subr.bf16.mxu1 %v5351_v23  ;;  %v5409_v22 = vld [vmem:[%s7025_s1 + $0x7a8] ss:$16 sps:$4 sm:$0xff]   ;;  %v5414_v23 = vld [vmem:[%s7025_s1 + $0x7c4] ss:$16 sps:$4 sm:$0xff]  }
  0xd1   : > { %2506 = vmatprep.mubr.bf16.mxu0 %v4233_v24  ;;  %2958 = vmatprep.mubr.bf16.mxu1 %v4233_v24  ;;  %v5417_v24 = vld [vmem:[%s7025_s1 + $0x7cc] ss:$16 sps:$4 sm:$0xff]  }
  0xd3   : > { %2574 = vmatpush1.bf16.msra.mxu0 %v5346_v25  ;;  %3026 = vmatpush1.bf16.msra.mxu1 %v5349_v26  ;;  %v4272_v25 = vcombine.low %v344_v14, %v348_v15  ;;  %v289_v26 = vld [vmem:[%s5732_s10 + $0x18] sm:$0xff] }
  0xd4   : > { %2575 = vmatprep.subr.bf16.mxu0 %v5354_v27  ;;  %3027 = vmatprep.subr.bf16.mxu1 %v5357_v28  ;;  %v293_v27 = vld [vmem:[%s5732_s10 + $0x38] sm:$0xff]  ;;  %v5412_v28 = vld [vmem:[%s7025_s1 + $0x7c0] ss:$16 sps:$4 sm:$0xff]  }
  0xd5   : > { %v4219_v32 = vcombine.high %v289_v26, %v293_v27  ;;  %v329_v14 = vld [vmem:[%s5732_s10 + $0x158] sm:$0xff] }
  0xd6   : > { %2507 = vmatmul.mubr.bf16.gmra.mrb[8].mxu0 %v4232_v31  ;;  %2959 = vmatmul.mubr.bf16.gmra.mrb[8].mxu1 %v4232_v31  ;;  %v5423_v31 = vld [vmem:[%s7025_s1 + $0x7ec] ss:$16 sps:$4 sm:$0xff]  }
  0xd7   : > { %2576 = vmatpush1.bf16.msra.mxu0 %v5352_v29  ;;  %3028 = vmatpush1.bf16.msra.mxu1 %v5355_v30  ;;  %v5415_v29 = vld [vmem:[%s7025_s1 + $0x7c8] ss:$16 sps:$4 sm:$0xff]   ;;  %v5420_v30 = vld [vmem:[%s7025_s1 + $0x7e4] ss:$16 sps:$4 sm:$0xff]  }
  0xd8   : > { %2577 = vmatprep.subr.bf16.mxu0 %v5360_v34  ;;  %3029 = vmatprep.subr.bf16.mxu1 %v5363_v35  ;;  %v5421_v34 = vld [vmem:[%s7025_s1 + $0x7e8] ss:$16 sps:$4 sm:$0xff]  }
  0xd9   : > { %2516 = vmatprep.mubr.bf16.mxu0 %v4241_v36  ;;  %2968 = vmatprep.mubr.bf16.mxu1 %v4241_v36  ;;  %v297_v35 = vld [vmem:[%s5732_s10 + $0x58] sm:$0xff] }
  0xda   : > { %v301_v36 = vld [vmem:[%s5732_s10 + $0x78] sm:$0xff] }
  0xdb   : > { %2578 = vmatpush1.bf16.msra.mxu0 %v5358_v37  ;;  %3030 = vmatpush1.bf16.msra.mxu1 %v5361_v38  ;;  %v5426_v37 = vld [vmem:[%s7027_s3 + $0x4] ss:$8 sps:$4 sm:$0xff]   ;;  %v333_v15 = vld [vmem:[%s5732_s10 + $0x178] sm:$0xff] }
  0xdc   : > { %2579 = vmatprep.subr.bf16.mxu0 %v5366_v39  ;;  %3031 = vmatprep.subr.bf16.mxu1 %v5369_v40  ;;  %v6428_v38 = vld [vmem:[%s7027_s3 + $0x104] ss:$8 sps:$4 sm:$0xff]   ;;  %v4218_v39 = vcombine.low %v289_v26, %v293_v27  ;;  %v4227_v40 = vcombine.high %v297_v35, %v301_v36  ;;  %v4258_v26 = vcombine.low %v329_v14, %v333_v15 }
  0xde   : > { %2517 = vmatmul.mubr.bf16.gmra.mrb[12].mxu0 %v4240_v43  ;;  %2969 = vmatmul.mubr.bf16.gmra.mrb[12].mxu1 %v4240_v43  ;;  %v5429_v43 = vld [vmem:[%s7027_s3 + $0x14] ss:$8 sps:$4 sm:$0xff]  }
  0xdf   : > { %2580 = vmatpush1.bf16.msra.mxu0 %v5364_v41  ;;  %3032 = vmatpush1.bf16.msra.mxu1 %v5367_v42  ;;  %v5424_v41 = vld [vmem:[%s7027_s3] ss:$8 sps:$4 sm:$0xff]  }
  0xe0   : > { %2581 = vmatprep.subr.bf16.mxu0 %v5372_v46  ;;  %3033 = vmatprep.subr.bf16.mxu1 %v5375_v47  ;;  %v6436_v42 = vld [vmem:[%s7027_s3 + $0x100] ss:$8 sps:$4 sm:$0xff]   ;;  %v309_v46 = vld [vmem:[%s5732_s10 + $0xb8] sm:$0xff] }
  0xe1   : > { %2526 = vmatprep.mubr.bf16.mxu0 %v4249_v50  ;;  %2978 = vmatprep.mubr.bf16.mxu1 %v4249_v50  ;;  %v5427_v47 = vld [vmem:[%s7027_s3 + $0x10] ss:$8 sps:$4 sm:$0xff]   ;;  %v6465_v50 = vld [vmem:[%s7027_s3 + $0x124] ss:$8 sps:$4 sm:$0xff]  }
  0xe3   : > { %2582 = vmatpush1.bf16.msra.mxu0 %v5370_v48  ;;  %3034 = vmatpush1.bf16.msra.mxu1 %v5373_v49  ;;  %v6456_v48 = vld [vmem:[%s7027_s3 + $0x110] ss:$8 sps:$4 sm:$0xff]   ;;  %v5432_v49 = vld [vmem:[%s7027_s3 + $0x24] ss:$8 sps:$4 sm:$0xff]  }
  0xe4   : > { %2583 = vmatprep.subr.bf16.mxu0 %v5378_v51  ;;  %3035 = vmatprep.subr.bf16.mxu1 %v5381_v52  ;;  %v4226_v51 = vcombine.low %v297_v35, %v301_v36  ;;  %v4235_v52 = vcombine.high %v305_v45, %v309_v46  ;;  %v5472_v36 = vld [vmem:[%s7027_s3 + $0xc0] ss:$8 sps:$4 sm:$0xff]  }
  0xe6   : > { %2527 = vmatmul.mubr.bf16.gmra.mrb[16].mxu0 %v4248_v57  ;;  %2979 = vmatmul.mubr.bf16.gmra.mrb[16].mxu1 %v4248_v57  ;;  %v313_v57 = vld [vmem:[%s5732_s10 + $0xd8] sm:$0xff] }
  0xe7   : > { %2584 = vmatpush1.bf16.msra.mxu0 %v5376_v55  ;;  %3036 = vmatpush1.bf16.msra.mxu1 %v5379_v56  ;;  %v5435_v55 = vld [vmem:[%s7027_s3 + $0x34] ss:$8 sps:$4 sm:$0xff]  }
  0xe8   : > { %2585 = vmatprep.subr.bf16.mxu0 %v5384_v58  ;;  %3037 = vmatprep.subr.bf16.mxu1 %v5387_v59  ;;  %v6483_v56 = vld [vmem:[%s7027_s3 + $0x134] ss:$8 sps:$4 sm:$0xff]   ;;  %v5433_v59 = vld [vmem:[%s7027_s3 + $0x30] ss:$8 sps:$4 sm:$0xff]  }
  0xe9   : > { %2536 = vmatprep.mubr.bf16.mxu0 %v4257_v62  ;;  %2988 = vmatprep.mubr.bf16.mxu1 %v4257_v62  ;;  %v317_v58 = vld [vmem:[%s5732_s10 + $0xf8] sm:$0xff]  ;;  %v6503_v62 = vld [vmem:[%s7027_s3 + $0x144] ss:$8 sps:$4 sm:$0xff]  }
  0xeb   : > { %2586 = vmatpush1.bf16.msra.mxu0 %v5382_v60  ;;  %3038 = vmatpush1.bf16.msra.mxu1 %v5385_v61  ;;  %v6494_v60 = vld [vmem:[%s7027_s3 + $0x130] ss:$8 sps:$4 sm:$0xff]   ;;  %v5438_v61 = vld [vmem:[%s7027_s3 + $0x44] ss:$8 sps:$4 sm:$0xff]  }
  0xec   : > { %2587 = vmatprep.subr.bf16.mxu0 %v5390_v63  ;;  %3039 = vmatprep.subr.bf16.mxu1 %v5393_v0  ;;  %v4234_v63 = vcombine.low %v305_v45, %v309_v46  ;;  %v4243_v0 = vcombine.high %v313_v57, %v317_v58  ;;  %v5484_v45 = vld [vmem:[%s7027_s3 + $0xe0] ss:$8 sps:$4 sm:$0xff]  }
  0xed   : > { %v6604_v46 = vld [vmem:[%s7027_s3 + $0x160] ss:$8 sps:$4 sm:$0xff]  }
  0xee   : > { %2537 = vmatmul.mubr.bf16.gmra.mrb[20].mxu0 %v4256_v5  ;;  %2989 = vmatmul.mubr.bf16.gmra.mrb[20].mxu1 %v4256_v5  ;;  %v321_v5 = vld [vmem:[%s5732_s10 + $0x118] sm:$0xff] }
  0xef   : > { %2588 = vmatpush1.bf16.msra.mxu0 %v5388_v3  ;;  %3040 = vmatpush1.bf16.msra.mxu1 %v5391_v4  ;;  %v5441_v3 = vld [vmem:[%s7027_s3 + $0x54] ss:$8 sps:$4 sm:$0xff]  }
  0xf0   : > { %2589 = vmatprep.subr.bf16.mxu0 %v5396_v6  ;;  %3041 = vmatprep.subr.bf16.mxu1 %v5399_v7  ;;  %v6521_v4 = vld [vmem:[%s7027_s3 + $0x154] ss:$8 sps:$4 sm:$0xff]   ;;  %v5439_v7 = vld [vmem:[%s7027_s3 + $0x50] ss:$8 sps:$4 sm:$0xff]  }
  0xf1   : > { %2546 = vmatprep.mubr.bf16.mxu0 %v4265_v10  ;;  %2998 = vmatprep.mubr.bf16.mxu1 %v4265_v10  ;;  %v325_v6 = vld [vmem:[%s5732_s10 + $0x138] sm:$0xff]  ;;  %v4242_v10 = vcombine.low %v313_v57, %v317_v58  ;;  %v6654_v58 = vld [vmem:[%s7027_s3 + $0x1a4] ss:$8 sps:$4 sm:$0xff]  }
  0xf2   : > { %v6642_v57 = vld [vmem:[%s7027_s3 + $0x194] ss:$8 sps:$4 sm:$0xff]  }
  0xf3   : > { %2590 = vmatpush1.bf16.msra.mxu0 %v5394_v8  ;;  %3042 = vmatpush1.bf16.msra.mxu1 %v5397_v9  ;;  %v6532_v8 = vld [vmem:[%s7027_s3 + $0x150] ss:$8 sps:$4 sm:$0xff]   ;;  %v5444_v9 = vld [vmem:[%s7027_s3 + $0x64] ss:$8 sps:$4 sm:$0xff]  }
  0xf4   : > { %2591 = vmatprep.subr.bf16.mxu0 %v5402_v11  ;;  %3043 = vmatprep.subr.bf16.mxu1 %v5405_v12  ;;  %v4251_v11 = vcombine.high %v321_v5, %v325_v6  ;;  %v5442_v12 = vld [vmem:[%s7027_s3 + $0x60] ss:$8 sps:$4 sm:$0xff]  }
  0xf6   : > { %2547 = vmatmul.mubr.bf16.gmra.mrb[24].mxu0 %v4264_v13  ;;  %2999 = vmatmul.mubr.bf16.gmra.mrb[24].mxu1 %v4264_v13  ;;  %v5447_v13 = vld [vmem:[%s7027_s3 + $0x74] ss:$8 sps:$4 sm:$0xff]  }
  0xf7   : > { %2592 = vmatpush1.bf16.msra.mxu0 %v5400_v16  ;;  %3044 = vmatpush1.bf16.msra.mxu1 %v5403_v17  ;;  %v5445_v16 = vld [vmem:[%s7027_s3 + $0x70] ss:$8 sps:$4 sm:$0xff]   ;;  %v5450_v17 = vld [vmem:[%s7027_s3 + $0x84] ss:$8 sps:$4 sm:$0xff]  }
  0xf8   : > { %2593 = vmatprep.subr.bf16.mxu0 %v5408_v18  ;;  %3045 = vmatprep.subr.bf16.mxu1 %v5411_v19  ;;  %v4250_v18 = vcombine.low %v321_v5, %v325_v6  ;;  %v4259_v19 = vcombine.high %v329_v14, %v333_v15  ;;  %v6695_v5 = vld [vmem:[%s7027_s3 + $0x1d0] ss:$8 sps:$4 sm:$0xff]   ;;  %v6702_v6 = vld [vmem:[%s7027_s3 + $0x1e4] ss:$8 sps:$4 sm:$0xff]   ;;  %v606_v15 = vld [vmem:[%s7026_s2] sm:$0xf] }
  0xf9   : > { %2556 = vmatprep.mubr.bf16.mxu0 %v4273_v20  ;;  %3008 = vmatprep.mubr.bf16.mxu1 %v4273_v20  ;;  %v5448_v20 = vld [vmem:[%s7027_s3 + $0x80] ss:$8 sps:$4 sm:$0xff]  }
  0xfb   : > { %2594 = vmatpush1.bf16.msra.mxu0 %v5406_v21  ;;  %3046 = vmatpush1.bf16.msra.mxu1 %v5409_v22  ;;  %v5456_v21 = vld [vmem:[%s7027_s3 + $0x94] ss:$8 sps:$4 sm:$0xff]  }
  0xfc   : > { %2595 = vmatprep.subr.bf16.mxu0 %v5414_v23  ;;  %3047 = vmatprep.subr.bf16.mxu1 %v5417_v24  ;;  %v337_v22 = vld [vmem:[%s5732_s10 + $0x198] sm:$0xff] }
  0xfd   : > { %v341_v23 = vld [vmem:[%s5732_s10 + $0x1b8] sm:$0xff] }
  0xfe   : > { %2557 = vmatmul.mubr.bf16.gmra.mrb[28].mxu0 %v4272_v25  ;;  %3009 = vmatmul.mubr.bf16.gmra.mrb[28].mxu1 %v4272_v25  ;;  %v5454_v24 = vld [vmem:[%s7027_s3 + $0x90] ss:$8 sps:$4 sm:$0xff]   ;;  %v5462_v25 = vld [vmem:[%s7027_s3 + $0xa4] ss:$8 sps:$4 sm:$0xff]   ;;  %v4267_v27 = vcombine.high %v337_v22, %v341_v23 }
  0xff   : > { %2596 = vmatpush1.bf16.msra.mxu0 %v5412_v28  ;;  %3048 = vmatpush1.bf16.msra.mxu1 %v5415_v29  ;;  %v5460_v28 = vld [vmem:[%s7027_s3 + $0xa0] ss:$8 sps:$4 sm:$0xff]   ;;  %v5468_v29 = vld [vmem:[%s7027_s3 + $0xb4] ss:$8 sps:$4 sm:$0xff]  }
 0x100   : > { %2597 = vmatprep.subr.bf16.mxu0 %v5420_v30  ;;  %3049 = vmatprep.subr.bf16.mxu1 %v5423_v31  ;;  %v345_v30 = vld [vmem:[%s5732_s10 + $0x1d8] sm:$0xff] }
 0x101   : > { %2599 = vmatprep.mubr.bf16.mxu0 %v4219_v32  ;;  %3051 = vmatprep.mubr.bf16.mxu1 %v4219_v32  ;;  %v349_v31 = vld [vmem:[%s5732_s10 + $0x1f8] sm:$0xff] }
 0x102   : > { %v5466_v32 = vld [vmem:[%s7027_s3 + $0xb0] ss:$8 sps:$4 sm:$0xff]   ;;  %v4275_v35 = vcombine.high %v345_v30, %v349_v31 }
 0x103   : > { %2598 = vmatpush1.bf16.msra.mxu0 %v5418_v33  ;;  %3050 = vmatpush1.bf16.msra.mxu1 %v5421_v34  ;;  %v5474_v33 = vld [vmem:[%s7027_s3 + $0xc4] ss:$8 sps:$4 sm:$0xff]   ;;  %v4266_v34 = vcombine.low %v337_v22, %v341_v23 }
 0x104   : > { %3624 = vmatprep.subr.bf16.mxu0 %v5426_v37  ;;  %4680 = vmatprep.subr.bf16.mxu1 %v6428_v38  ;;  %v5480_v37 = vld [vmem:[%s7027_s3 + $0xd4] ss:$8 sps:$4 sm:$0xff]  }
 0x106   : > { %2600 = vmatmul.mubr.bf16.vlgmr.msra.gmra.mrb[0].mxu0 %v4218_v39  ;;  %3052 = vmatmul.mubr.bf16.vlgmr.msra.gmra.mrb[0].mxu1 %v4218_v39  ;;  %v5478_v39 = vld [vmem:[%s7027_s3 + $0xd0] ss:$8 sps:$4 sm:$0xff]  }
 0x107   : > { %2609 = vmatprep.mubr.bf16.mxu0 %v4227_v40  ;;  %3061 = vmatprep.mubr.bf16.mxu1 %v4227_v40  ;;  %v4274_v40 = vcombine.low %v345_v30, %v349_v31 }
 0x108   : > { %3625 = vmatpush1.bf16.msra.mxu0 %v5424_v41  ;;  %4696 = vmatpush1.bf16.msra.mxu1 %v6436_v42  ;;  %v5486_v41 = vld [vmem:[%s7027_s3 + $0xe4] ss:$8 sps:$4 sm:$0xff]  }
 0x109   : > { %3626 = vmatprep.subr.bf16.mxu0 %v5429_v43  ;;  %4681 = vmatprep.subr.bf16.mxu1 %v6445_v44  ;;  %v6596_v43 = vld [vmem:[%s7027_s3 + $0x164] ss:$8 sps:$4 sm:$0xff]  }
 0x10c   : > { %3627 = vmatpush1.bf16.msra.mxu0 %v5427_v47  ;;  %4697 = vmatpush1.bf16.msra.mxu1 %v6456_v48  ;;  %v5492_v47 = vld [vmem:[%s7027_s3 + $0xf4] ss:$8 sps:$4 sm:$0xff]  }
 0x10d   : > { %3628 = vmatprep.subr.bf16.mxu0 %v5432_v49  ;;  %4682 = vmatprep.subr.bf16.mxu1 %v6465_v50  ;;  %v6614_v49 = vld [vmem:[%s7027_s3 + $0x174] ss:$8 sps:$4 sm:$0xff]  }
 0x10e   : > { %2610 = vmatmul.mubr.bf16.gmra.mrb[4].mxu0 %v4226_v51  ;;  %3062 = vmatmul.mubr.bf16.gmra.mrb[4].mxu1 %v4226_v51  ;;  %v5490_v51 = vld [vmem:[%s7027_s3 + $0xf0] ss:$8 sps:$4 sm:$0xff]  }
 0x10f   : > { %2619 = vmatprep.mubr.bf16.mxu0 %v4235_v52  ;;  %3071 = vmatprep.mubr.bf16.mxu1 %v4235_v52  ;;  %v6622_v52 = vld [vmem:[%s7027_s3 + $0x170] ss:$8 sps:$4 sm:$0xff]  }
 0x110   : > { %3629 = vmatpush1.bf16.msra.mxu0 %v5430_v53  ;;  %4698 = vmatpush1.bf16.msra.mxu1 %v6474_v54  ;;  %v6630_v53 = vld [vmem:[%s7027_s3 + $0x184] ss:$8 sps:$4 sm:$0xff]  }
 0x111   : > { %3630 = vmatprep.subr.bf16.mxu0 %v5435_v55  ;;  %4683 = vmatprep.subr.bf16.mxu1 %v6483_v56  ;;  %v6635_v55 = vld [vmem:[%s7027_s3 + $0x180] ss:$8 sps:$4 sm:$0xff]  }
 0x114   : > { %3631 = vmatpush1.bf16.msra.mxu0 %v5433_v59  ;;  %4699 = vmatpush1.bf16.msra.mxu1 %v6494_v60  ;;  %v6659_v59 = vld [vmem:[%s7027_s3 + $0x1a0] ss:$8 sps:$4 sm:$0xff]  }
 0x115   : > { %3632 = vmatprep.subr.bf16.mxu0 %v5438_v61  ;;  %4684 = vmatprep.subr.bf16.mxu1 %v6503_v62  ;;  %v6666_v61 = vld [vmem:[%s7027_s3 + $0x1b4] ss:$8 sps:$4 sm:$0xff]  }
 0x116   : > { %2620 = vmatmul.mubr.bf16.gmra.mrb[8].mxu0 %v4234_v63  ;;  %3072 = vmatmul.mubr.bf16.gmra.mrb[8].mxu1 %v4234_v63  ;;  %v6671_v63 = vld [vmem:[%s7027_s3 + $0x1b0] ss:$8 sps:$4 sm:$0xff]  }
 0x117   : > { %2629 = vmatprep.mubr.bf16.mxu0 %v4243_v0  ;;  %3081 = vmatprep.mubr.bf16.mxu1 %v4243_v0  ;;  %v6678_v0 = vld [vmem:[%s7027_s3 + $0x1c4] ss:$8 sps:$4 sm:$0xff]  }
 0x118   : > { %3633 = vmatpush1.bf16.msra.mxu0 %v5436_v1  ;;  %4700 = vmatpush1.bf16.msra.mxu1 %v6512_v2  ;;  %v6683_v1 = vld [vmem:[%s7027_s3 + $0x1c0] ss:$8 sps:$4 sm:$0xff]  }
 0x119   : > { %3634 = vmatprep.subr.bf16.mxu0 %v5441_v3  ;;  %4685 = vmatprep.subr.bf16.mxu1 %v6521_v4  ;;  %v6690_v3 = vld [vmem:[%s7027_s3 + $0x1d4] ss:$8 sps:$4 sm:$0xff]  }
 0x11c   : > { %3635 = vmatpush1.bf16.msra.mxu0 %v5439_v7  ;;  %4701 = vmatpush1.bf16.msra.mxu1 %v6532_v8  ;;  %v6707_v7 = vld [vmem:[%s7027_s3 + $0x1e0] ss:$8 sps:$4 sm:$0xff]  }
 0x11d   : > { %3636 = vmatprep.subr.bf16.mxu0 %v5444_v9  ;;  %4686 = vmatprep.subr.bf16.mxu1 %v6596_v43  ;;  %v6714_v9 = vld [vmem:[%s7027_s3 + $0x1f4] ss:$8 sps:$4 sm:$0xff]  }
 0x11e   : > { %2630 = vmatmul.mubr.bf16.gmra.mrb[12].mxu0 %v4242_v10  ;;  %3082 = vmatmul.mubr.bf16.gmra.mrb[12].mxu1 %v4242_v10  ;;  %v6719_v10 = vld [vmem:[%s7027_s3 + $0x1f0] ss:$8 sps:$4 sm:$0xff]  }
 0x11f   : > { %2639 = vmatprep.mubr.bf16.mxu0 %v4251_v11  ;;  %3091 = vmatprep.mubr.bf16.mxu1 %v4251_v11  ;;  %v608_v11 = vlaneseq }
 0x120   : > { %3637 = vmatpush1.bf16.msra.mxu0 %v5442_v12  ;;  %4702 = vmatpush1.bf16.msra.mxu1 %v6604_v46 }
 0x121   : > { %3638 = vmatprep.subr.bf16.mxu0 %v5447_v13  ;;  %4687 = vmatprep.subr.bf16.mxu1 %v6614_v49  ;;  %v6723_v12 = vshrl.u32 %v608_v11, 7 }
 0x123   : > { %v610_v13 = vsub.s32 0, %v6723_v12  ;;  %v618_v14 = vsub.s32 2, %v6723_v12 }
 0x124   : > { %3639 = vmatpush1.bf16.msra.mxu0 %v5445_v16  ;;  %4703 = vmatpush1.bf16.msra.mxu1 %v6622_v52  ;;  %v614_v16 = vsub.s32 1, %v6723_v12 }
 0x125   : > { %3640 = vmatprep.subr.bf16.mxu0 %v5450_v17  ;;  %4688 = vmatprep.subr.bf16.mxu1 %v6630_v53  ;;  %v622_v17 = vsub.s32 3, %v6723_v12 }
 0x126   : > { %2640 = vmatmul.mubr.bf16.gmra.mrb[16].mxu0 %v4250_v18  ;;  %3092 = vmatmul.mubr.bf16.gmra.mrb[16].mxu1 %v4250_v18  ;;  %v6734_v18 = vrot.slane %v606_v15, %v610_v13 }
 0x127   : > { %2649 = vmatprep.mubr.bf16.mxu0 %v4259_v19  ;;  %3101 = vmatprep.mubr.bf16.mxu1 %v4259_v19  ;;  %v6736_v19 = vrot.slane %v606_v15, %v618_v14 }
 0x128   : > { %3641 = vmatpush1.bf16.msra.mxu0 %v5448_v20  ;;  %4704 = vmatpush1.bf16.msra.mxu1 %v6635_v55  ;;  %v6740_v20 = vrot.slane %v606_v15, %v614_v16 }
 0x129   : > { %3642 = vmatprep.subr.bf16.mxu0 %v5456_v21  ;;  %4689 = vmatprep.subr.bf16.mxu1 %v6642_v57  ;;  %v6742_v21 = vrot.slane %v606_v15, %v622_v17 }
 0x12c   : > { %3643 = vmatpush1.bf16.msra.mxu0 %v5454_v24 }
 0x12d   : > { %3644 = vmatprep.subr.bf16.mxu0 %v5462_v25 }
 0x12e   : > { %2650 = vmatmul.mubr.bf16.gmra.mrb[20].mxu0 %v4258_v26  ;;  %3102 = vmatmul.mubr.bf16.gmra.mrb[20].mxu1 %v4258_v26 }
 0x12f   : > { %2659 = vmatprep.mubr.bf16.mxu0 %v4267_v27  ;;  %3111 = vmatprep.mubr.bf16.mxu1 %v4267_v27 }
 0x130   : > { %3645 = vmatpush1.bf16.msra.mxu0 %v5460_v28 }
 0x131   : > { %3646 = vmatprep.subr.bf16.mxu0 %v5468_v29 }
 0x134   : > { %3647 = vmatpush1.bf16.msra.mxu0 %v5466_v32 }
 0x135   : > { %3648 = vmatprep.subr.bf16.mxu0 %v5474_v33 }
 0x136   : > { %2660 = vmatmul.mubr.bf16.gmra.mrb[24].mxu0 %v4266_v34  ;;  %3112 = vmatmul.mubr.bf16.gmra.mrb[24].mxu1 %v4266_v34 }
 0x137   : > { %2669 = vmatprep.mubr.bf16.mxu0 %v4275_v35  ;;  %3121 = vmatprep.mubr.bf16.mxu1 %v4275_v35 }
 0x138   : > { %3649 = vmatpush1.bf16.msra.mxu0 %v5472_v36 }
 0x139   : > { %3650 = vmatprep.subr.bf16.mxu0 %v5480_v37 }
 0x13c   : > { %3651 = vmatpush1.bf16.msra.mxu0 %v5478_v39 }
 0x13d   : > { %3652 = vmatprep.subr.bf16.mxu0 %v5486_v41 }
 0x13e   : > { %2670 = vmatmul.mubr.bf16.gmra.mrb[28].mxu0 %v4274_v40  ;;  %3122 = vmatmul.mubr.bf16.gmra.mrb[28].mxu1 %v4274_v40 }
 0x140   : > { %3653 = vmatpush1.bf16.msra.mxu0 %v5484_v45 }
 0x141   : > { %3654 = vmatprep.subr.bf16.mxu0 %v5492_v47 }
 0x144   : > { %3655 = vmatpush1.bf16.msra.mxu0 %v5490_v51 }
 0x145   : > { %3737 = vmatprep.subr.bf16.mxu0 %v6428_v38  ;;  %v6647_v38 = vld [vmem:[%s7027_s3 + $0x190] ss:$8 sps:$4 sm:$0xff]  }
 0x146   : > { %4705 = vmatpush1.bf16.msra.mxu1 %v6647_v38 }
 0x147   : > { %4690 = vmatprep.subr.bf16.mxu1 %v6654_v58 }
 0x14a   : > { %4706 = vmatpush1.bf16.msra.mxu1 %v6659_v59 }
 0x14b   : > { %4691 = vmatprep.subr.bf16.mxu1 %v6666_v61 }
 0x14e   : > { %4707 = vmatpush1.bf16.msra.mxu1 %v6671_v63 }
 0x14f   : > { %4692 = vmatprep.subr.bf16.mxu1 %v6678_v0 }
 0x152   : > { %4708 = vmatpush1.bf16.msra.mxu1 %v6683_v1 }
 0x153   : > { %4693 = vmatprep.subr.bf16.mxu1 %v6690_v3 }
 0x156   : > { %4709 = vmatpush1.bf16.msra.mxu1 %v6695_v5 }
 0x157   : > { %4694 = vmatprep.subr.bf16.mxu1 %v6702_v6 }
 0x15a   : > { %4710 = vmatpush1.bf16.msra.mxu1 %v6707_v7 }
 0x15b   : > { %4695 = vmatprep.subr.bf16.mxu1 %v6714_v9 }
 0x15e   : > { %4711 = vmatpush1.bf16.msra.mxu1 %v6719_v10 }
 0x1d9   : > { %v2601_v22 = vpop.f32.mrb[0].mxu0  ;;  %v3053_v23 = vpop.f32.mrb[0].mxu1 }
 0x1da   : > { %v4712_v24 = vadd.f32 %v2601_v22, %v6734_v18  ;;  %v4744_v25 = vadd.f32 %v3053_v23, %v6736_v19  ;;  %v2603_v26 = vpop.f32.mrb[1].mxu0  ;;  %v3055_v27 = vpop.f32.mrb[1].mxu1 }
 0x1db   : > { %v4713_v28 = vadd.f32 %v2603_v26, %v6740_v20  ;;  %v4745_v29 = vadd.f32 %v3055_v27, %v6742_v21  ;;  %v2605_v30 = vpop.f32.mrb[2].mxu0  ;;  %v3057_v31 = vpop.f32.mrb[2].mxu1 }
 0x1dc   : > { %v4714_v32 = vadd.f32 %v2605_v30, %v6734_v18  ;;  %v4746_v33 = vadd.f32 %v3057_v31, %v6736_v19  ;;  %v2607_v34 = vpop.f32.mrb[3].mxu0  ;;  %v3059_v35 = vpop.f32.mrb[3].mxu1  ;;  %v3132_v39 = vmax.f32 %v4712_v24, 0.0  ;;  %v3134_v40 = vmax.f32 %v4744_v25, 0.0 }
 0x1dd   : > { %v4715_v36 = vadd.f32 %v2607_v34, %v6740_v20  ;;  %v4747_v37 = vadd.f32 %v3059_v35, %v6742_v21  ;;  %v3133_v47 = vmax.f32 %v4713_v28, 0.0  ;;  %v3135_v51 = vmax.f32 %v4745_v29, 0.0 }
 0x1de   : > { %v3136_v41 = vmax.f32 %v4714_v32, 0.0  ;;  %v3138_v45 = vmax.f32 %v4746_v33, 0.0 }
 0x1df   : > { %v3137_v11 = vmax.f32 %v4715_v36, 0.0  ;;  %v3139_v14 = vmax.f32 %v4747_v37, 0.0 }
 0x1e0   : > { %v3196_v15 = vpack.c.bf16 %v3136_v41, %v3132_v39  ;;  %v6752_v17 = vpack.c.bf16 %v3138_v45, %v3134_v40 }
 0x1e1   : > { %v3197_v22 = vpack.c.bf16 %v3137_v11, %v3133_v47  ;;  %v6754_v23 = vpack.c.bf16 %v3139_v14, %v3135_v51  ;;  %v2611_v26 = vpop.f32.mrb[4].mxu0  ;;  %v3063_v27 = vpop.f32.mrb[4].mxu1 }
 0x1e2   : > { %v4716_v30 = vadd.f32 %v2611_v26, %v6734_v18  ;;  %v4748_v31 = vadd.f32 %v3063_v27, %v6736_v19  ;;  %v2613_v24 = vpop.f32.mrb[5].mxu0  ;;  %v3065_v25 = vpop.f32.mrb[5].mxu1 }
 0x1e3   : > { %v4717_v32 = vadd.f32 %v2613_v24, %v6740_v20  ;;  %v4749_v28 = vadd.f32 %v3065_v25, %v6742_v21  ;;  %v2615_v29 = vpop.f32.mrb[6].mxu0  ;;  %v3067_v33 = vpop.f32.mrb[6].mxu1  ;;  %3656 = vmatprep.mubr.bf16.mxu0 %v3197_v22 }
 0x1e4   : > { %v4718_v34 = vadd.f32 %v2615_v29, %v6734_v18  ;;  %v4750_v35 = vadd.f32 %v3067_v33, %v6736_v19  ;;  %v2617_v36 = vpop.f32.mrb[7].mxu0  ;;  %v3069_v37 = vpop.f32.mrb[7].mxu1  ;;  %3657 = vmatmul.mubr.bf16.vlgmr.msra.gmra.mrb[32].mxu0 %v3196_v15  ;;  %v3140_v41 = vmax.f32 %v4716_v30, 0.0  ;;  %v3142_v45 = vmax.f32 %v4748_v31, 0.0 }
 0x1e5   : > { %v4719_v39 = vadd.f32 %v2617_v36, %v6740_v20  ;;  %v4751_v40 = vadd.f32 %v3069_v37, %v6742_v21  ;;  %3738 = vmatpush1.bf16.msra.mxu0 %v6436_v42  ;;  %v3141_v11 = vmax.f32 %v4717_v32, 0.0  ;;  %v3143_v14 = vmax.f32 %v4749_v28, 0.0 }
 0x1e6   : > { %v3144_v47 = vmax.f32 %v4718_v34, 0.0  ;;  %v3146_v51 = vmax.f32 %v4750_v35, 0.0  ;;  %3739 = vmatprep.subr.bf16.mxu0 %v6445_v44 }
 0x1e7   : > { %v3145_v22 = vmax.f32 %v4719_v39, 0.0  ;;  %v3147_v26 = vmax.f32 %v4751_v40, 0.0 }
 0x1e8   : > { %v3200_v27 = vpack.c.bf16 %v3144_v47, %v3140_v41  ;;  %v6766_v24 = vpack.c.bf16 %v3146_v51, %v3142_v45 }
 0x1e9   : > { %v3201_v15 = vpack.c.bf16 %v3145_v22, %v3141_v11  ;;  %v6768_v25 = vpack.c.bf16 %v3147_v26, %v3143_v14  ;;  %v2621_v29 = vpop.f32.mrb[8].mxu0  ;;  %v3073_v33 = vpop.f32.mrb[8].mxu1  ;;  %3740 = vmatpush1.bf16.msra.mxu0 %v6456_v48 }
 0x1ea   : > { %v4720_v42 = vadd.f32 %v2621_v29, %v6734_v18  ;;  %v4752_v30 = vadd.f32 %v3073_v33, %v6736_v19  ;;  %v2623_v31 = vpop.f32.mrb[9].mxu0  ;;  %v3075_v44 = vpop.f32.mrb[9].mxu1  ;;  %3741 = vmatprep.subr.bf16.mxu0 %v6465_v50 }
 0x1eb   : > { %v4721_v32 = vadd.f32 %v2623_v31, %v6740_v20  ;;  %v4753_v28 = vadd.f32 %v3075_v44, %v6742_v21  ;;  %v2625_v34 = vpop.f32.mrb[10].mxu0  ;;  %v3077_v35 = vpop.f32.mrb[10].mxu1  ;;  %3666 = vmatprep.mubr.bf16.mxu0 %v3201_v15 }
 0x1ec   : > { %v4722_v36 = vadd.f32 %v2625_v34, %v6734_v18  ;;  %v4754_v37 = vadd.f32 %v3077_v35, %v6736_v19  ;;  %v2627_v48 = vpop.f32.mrb[11].mxu0  ;;  %v3079_v39 = vpop.f32.mrb[11].mxu1  ;;  %3667 = vmatmul.mubr.bf16.gmra.mrb[36].mxu0 %v3200_v27  ;;  %v3148_v50 = vmax.f32 %v4720_v42, 0.0  ;;  %v3150_v45 = vmax.f32 %v4752_v30, 0.0 }
 0x1ed   : > { %v4723_v40 = vadd.f32 %v2627_v48, %v6740_v20  ;;  %v4755_v41 = vadd.f32 %v3079_v39, %v6742_v21  ;;  %3742 = vmatpush1.bf16.msra.mxu0 %v6474_v54  ;;  %v3149_v11 = vmax.f32 %v4721_v32, 0.0  ;;  %v3151_v14 = vmax.f32 %v4753_v28, 0.0 }
 0x1ee   : > { %v3152_v47 = vmax.f32 %v4722_v36, 0.0  ;;  %v3154_v51 = vmax.f32 %v4754_v37, 0.0  ;;  %3743 = vmatprep.subr.bf16.mxu0 %v6483_v56 }
 0x1ef   : > { %v3153_v22 = vmax.f32 %v4723_v40, 0.0  ;;  %v3155_v26 = vmax.f32 %v4755_v41, 0.0 }
 0x1f0   : > { %v3204_v15 = vpack.c.bf16 %v3152_v47, %v3148_v50  ;;  %v6782_v29 = vpack.c.bf16 %v3154_v51, %v3150_v45 }
 0x1f1   : > { %v3205_v27 = vpack.c.bf16 %v3153_v22, %v3149_v11  ;;  %v6784_v33 = vpack.c.bf16 %v3155_v26, %v3151_v14  ;;  %v2631_v31 = vpop.f32.mrb[12].mxu0  ;;  %v3083_v44 = vpop.f32.mrb[12].mxu1  ;;  %3744 = vmatpush1.bf16.msra.mxu0 %v6494_v60 }
 0x1f2   : > { %v4724_v54 = vadd.f32 %v2631_v31, %v6734_v18  ;;  %v4756_v42 = vadd.f32 %v3083_v44, %v6736_v19  ;;  %v2633_v30 = vpop.f32.mrb[13].mxu0  ;;  %v3085_v56 = vpop.f32.mrb[13].mxu1  ;;  %3745 = vmatprep.subr.bf16.mxu0 %v6503_v62 }
 0x1f3   : > { %v4725_v32 = vadd.f32 %v2633_v30, %v6740_v20  ;;  %v4757_v28 = vadd.f32 %v3085_v56, %v6742_v21  ;;  %v2635_v34 = vpop.f32.mrb[14].mxu0  ;;  %v3087_v35 = vpop.f32.mrb[14].mxu1  ;;  %3676 = vmatprep.mubr.bf16.mxu0 %v3205_v27 }
 0x1f4   : > { %v4726_v36 = vadd.f32 %v2635_v34, %v6734_v18  ;;  %v4758_v37 = vadd.f32 %v3087_v35, %v6736_v19  ;;  %v2637_v60 = vpop.f32.mrb[15].mxu0  ;;  %v3089_v48 = vpop.f32.mrb[15].mxu1  ;;  %3677 = vmatmul.mubr.bf16.gmra.mrb[40].mxu0 %v3204_v15  ;;  %v3156_v62 = vmax.f32 %v4724_v54, 0.0  ;;  %v3158_v41 = vmax.f32 %v4756_v42, 0.0 }
 0x1f5   : > { %v4727_v39 = vadd.f32 %v2637_v60, %v6740_v20  ;;  %v4759_v40 = vadd.f32 %v3089_v48, %v6742_v21  ;;  %3746 = vmatpush1.bf16.msra.mxu0 %v6512_v2  ;;  %v3157_v47 = vmax.f32 %v4725_v32, 0.0  ;;  %v3159_v51 = vmax.f32 %v4757_v28, 0.0 }
 0x1f6   : > { %v3160_v50 = vmax.f32 %v4726_v36, 0.0  ;;  %v3162_v45 = vmax.f32 %v4758_v37, 0.0  ;;  %3747 = vmatprep.subr.bf16.mxu0 %v6521_v4 }
 0x1f7   : > { %v3161_v11 = vmax.f32 %v4727_v39, 0.0  ;;  %v3163_v14 = vmax.f32 %v4759_v40, 0.0 }
 0x1f8   : > { %v3208_v22 = vpack.c.bf16 %v3160_v50, %v3156_v62  ;;  %v6798_v26 = vpack.c.bf16 %v3162_v45, %v3158_v41 }
 0x1f9   : > { %v3209_v15 = vpack.c.bf16 %v3161_v11, %v3157_v47  ;;  %v6800_v27 = vpack.c.bf16 %v3163_v14, %v3159_v51  ;;  %v2641_v31 = vpop.f32.mrb[16].mxu0  ;;  %v3093_v44 = vpop.f32.mrb[16].mxu1  ;;  %3748 = vmatpush1.bf16.msra.mxu0 %v6532_v8 }
 0x1fa   : > { %v4728_v2 = vadd.f32 %v2641_v31, %v6734_v18  ;;  %v4760_v54 = vadd.f32 %v3093_v44, %v6736_v19  ;;  %v2643_v42 = vpop.f32.mrb[17].mxu0  ;;  %v3095_v4 = vpop.f32.mrb[17].mxu1  ;;  %3749 = vmatprep.subr.bf16.mxu0 %v6596_v43 }
 0x1fb   : > { %v4729_v30 = vadd.f32 %v2643_v42, %v6740_v20  ;;  %v4761_v56 = vadd.f32 %v3095_v4, %v6742_v21  ;;  %v2645_v32 = vpop.f32.mrb[18].mxu0  ;;  %v3097_v28 = vpop.f32.mrb[18].mxu1  ;;  %3686 = vmatprep.mubr.bf16.mxu0 %v3209_v15 }
 0x1fc   : > { %v4730_v34 = vadd.f32 %v2645_v32, %v6734_v18  ;;  %v4762_v35 = vadd.f32 %v3097_v28, %v6736_v19  ;;  %v2647_v8 = vpop.f32.mrb[19].mxu0  ;;  %v3099_v36 = vpop.f32.mrb[19].mxu1  ;;  %3687 = vmatmul.mubr.bf16.gmra.mrb[44].mxu0 %v3208_v22  ;;  %v3164_v43 = vmax.f32 %v4728_v2, 0.0  ;;  %v3166_v48 = vmax.f32 %v4760_v54, 0.0 }
 0x1fd   : > { %v4731_v37 = vadd.f32 %v2647_v8, %v6740_v20  ;;  %v4763_v60 = vadd.f32 %v3099_v36, %v6742_v21  ;;  %3750 = vmatpush1.bf16.msra.mxu0 %v6604_v46  ;;  %v3165_v62 = vmax.f32 %v4729_v30, 0.0  ;;  %v3167_v41 = vmax.f32 %v4761_v56, 0.0 }
 0x1fe   : > { %v3168_v39 = vmax.f32 %v4730_v34, 0.0  ;;  %v3170_v40 = vmax.f32 %v4762_v35, 0.0  ;;  %3751 = vmatprep.subr.bf16.mxu0 %v6614_v49 }
 0x1ff   : > { %v3169_v50 = vmax.f32 %v4731_v37, 0.0  ;;  %v3171_v45 = vmax.f32 %v4763_v60, 0.0 }
 0x200   : > { %v3212_v47 = vpack.c.bf16 %v3168_v39, %v3164_v43  ;;  %v3214_v51 = vpack.c.bf16 %v3170_v40, %v3166_v48 }
 0x201   : > { %v3213_v11 = vpack.c.bf16 %v3169_v50, %v3165_v62  ;;  %v3215_v14 = vpack.c.bf16 %v3171_v45, %v3167_v41  ;;  %v2651_v22 = vpop.f32.mrb[20].mxu0  ;;  %v3103_v15 = vpop.f32.mrb[20].mxu1  ;;  %3752 = vmatpush1.bf16.msra.mxu0 %v6622_v52 }
 0x202   : > { %v4732_v46 = vadd.f32 %v2651_v22, %v6734_v18  ;;  %v4764_v31 = vadd.f32 %v3103_v15, %v6736_v19  ;;  %v2653_v44 = vpop.f32.mrb[21].mxu0  ;;  %v3105_v2 = vpop.f32.mrb[21].mxu1  ;;  %3753 = vmatprep.subr.bf16.mxu0 %v6630_v53 }
 0x203   : > { %v4733_v49 = vadd.f32 %v2653_v44, %v6740_v20  ;;  %v4765_v54 = vadd.f32 %v3105_v2, %v6742_v21  ;;  %v2655_v42 = vpop.f32.mrb[22].mxu0  ;;  %v3107_v4 = vpop.f32.mrb[22].mxu1  ;;  %3696 = vmatprep.mubr.bf16.mxu0 %v3213_v11  ;;  %3809 = vmatprep.mubr.bf16.mxu1 %v3215_v14 }
 0x204   : > { %v4734_v30 = vadd.f32 %v2655_v42, %v6734_v18  ;;  %v4766_v52 = vadd.f32 %v3107_v4, %v6736_v19  ;;  %v2657_v56 = vpop.f32.mrb[23].mxu0  ;;  %v3109_v32 = vpop.f32.mrb[23].mxu1  ;;  %3697 = vmatmul.mubr.bf16.gmra.mrb[48].mxu0 %v3212_v47  ;;  %3810 = vmatmul.mubr.bf16.vlgmr.msra.gmra.mrb[32].mxu1 %v3214_v51  ;;  %v3172_v34 = vmax.f32 %v4732_v46, 0.0  ;;  %v3174_v35 = vmax.f32 %v4764_v31, 0.0 }
 0x205   : > { %v4735_v28 = vadd.f32 %v2657_v56, %v6740_v20  ;;  %v4767_v53 = vadd.f32 %v3109_v32, %v6742_v21  ;;  %3754 = vmatpush1.bf16.msra.mxu0 %v6635_v55  ;;  %v3173_v37 = vmax.f32 %v4733_v49, 0.0  ;;  %v3175_v60 = vmax.f32 %v4765_v54, 0.0 }
 0x206   : > { %v3176_v8 = vmax.f32 %v4734_v30, 0.0  ;;  %v3178_v36 = vmax.f32 %v4766_v52, 0.0  ;;  %3755 = vmatprep.subr.bf16.mxu0 %v6642_v57 }
 0x207   : > { %v3177_v43 = vmax.f32 %v4735_v28, 0.0  ;;  %v3179_v48 = vmax.f32 %v4767_v53, 0.0 }
 0x208   : > { %v3216_v39 = vpack.c.bf16 %v3176_v8, %v3172_v34  ;;  %v3218_v40 = vpack.c.bf16 %v3178_v36, %v3174_v35 }
 0x209   : > { %v3217_v62 = vpack.c.bf16 %v3177_v43, %v3173_v37  ;;  %v3219_v41 = vpack.c.bf16 %v3179_v48, %v3175_v60  ;;  %v2661_v50 = vpop.f32.mrb[24].mxu0  ;;  %v3113_v45 = vpop.f32.mrb[24].mxu1  ;;  %3756 = vmatpush1.bf16.msra.mxu0 %v6647_v38 }
 0x20a   : > { %v4736_v55 = vadd.f32 %v2661_v50, %v6734_v18  ;;  %v4768_v47 = vadd.f32 %v3113_v45, %v6736_v19  ;;  %v2663_v51 = vpop.f32.mrb[25].mxu0  ;;  %v3115_v11 = vpop.f32.mrb[25].mxu1  ;;  %3757 = vmatprep.subr.bf16.mxu0 %v6654_v58 }
 0x20b   : > { %v4737_v57 = vadd.f32 %v2663_v51, %v6740_v20  ;;  %v4769_v14 = vadd.f32 %v3115_v11, %v6742_v21  ;;  %v2665_v22 = vpop.f32.mrb[26].mxu0  ;;  %v3117_v15 = vpop.f32.mrb[26].mxu1  ;;  %3706 = vmatprep.mubr.bf16.mxu0 %v3217_v62  ;;  %3819 = vmatprep.mubr.bf16.mxu1 %v3219_v41 }
 0x20c   : > { %v4738_v46 = vadd.f32 %v2665_v22, %v6734_v18  ;;  %v4770_v38 = vadd.f32 %v3117_v15, %v6736_v19  ;;  %v2667_v31 = vpop.f32.mrb[27].mxu0  ;;  %v3119_v44 = vpop.f32.mrb[27].mxu1  ;;  %3707 = vmatmul.mubr.bf16.gmra.mrb[52].mxu0 %v3216_v39  ;;  %3820 = vmatmul.mubr.bf16.gmra.mrb[36].mxu1 %v3218_v40  ;;  %v3180_v49 = vmax.f32 %v4736_v55, 0.0  ;;  %v3182_v54 = vmax.f32 %v4768_v47, 0.0 }
 0x20d   : > { %v4739_v2 = vadd.f32 %v2667_v31, %v6740_v20  ;;  %v4771_v58 = vadd.f32 %v3119_v44, %v6742_v21  ;;  %3758 = vmatpush1.bf16.msra.mxu0 %v6659_v59  ;;  %v3181_v30 = vmax.f32 %v4737_v57, 0.0  ;;  %v3183_v52 = vmax.f32 %v4769_v14, 0.0 }
 0x20e   : > { %v3184_v42 = vmax.f32 %v4738_v46, 0.0  ;;  %v3186_v4 = vmax.f32 %v4770_v38, 0.0  ;;  %3759 = vmatprep.subr.bf16.mxu0 %v6666_v61 }
 0x20f   : > { %v3185_v56 = vmax.f32 %v4739_v2, 0.0  ;;  %v3187_v32 = vmax.f32 %v4771_v58, 0.0 }
 0x210   : > { %v3220_v28 = vpack.c.bf16 %v3184_v42, %v3180_v49  ;;  %v3222_v53 = vpack.c.bf16 %v3186_v4, %v3182_v54 }
 0x211   : > { %v3221_v34 = vpack.c.bf16 %v3185_v56, %v3181_v30  ;;  %v3223_v35 = vpack.c.bf16 %v3187_v32, %v3183_v52  ;;  %v2671_v8 = vpop.f32.mrb[28].mxu0  ;;  %v3123_v36 = vpop.f32.mrb[28].mxu1  ;;  %3760 = vmatpush1.bf16.msra.mxu0 %v6671_v63 }
 0x212   : > { %v4740_v59 = vadd.f32 %v2671_v8, %v6734_v18  ;;  %v4772_v37 = vadd.f32 %v3123_v36, %v6736_v19  ;;  %v2673_v60 = vpop.f32.mrb[29].mxu0  ;;  %v3125_v43 = vpop.f32.mrb[29].mxu1  ;;  %3761 = vmatprep.subr.bf16.mxu0 %v6678_v0 }
 0x213   : > { %v4741_v61 = vadd.f32 %v2673_v60, %v6740_v20  ;;  %v4773_v48 = vadd.f32 %v3125_v43, %v6742_v21  ;;  %v2675_v39 = vpop.f32.mrb[30].mxu0  ;;  %v3127_v40 = vpop.f32.mrb[30].mxu1  ;;  %3716 = vmatprep.mubr.bf16.mxu0 %v3221_v34  ;;  %3829 = vmatprep.mubr.bf16.mxu1 %v3223_v35 }
 0x214   : > { %v4742_v62 = vadd.f32 %v2675_v39, %v6734_v18  ;;  %v4774_v63 = vadd.f32 %v3127_v40, %v6736_v19  ;;  %v2677_v41 = vpop.f32.mrb[31].mxu0  ;;  %v3129_v50 = vpop.f32.mrb[31].mxu1  ;;  %3717 = vmatmul.mubr.bf16.gmra.mrb[56].mxu0 %v3220_v28  ;;  %3830 = vmatmul.mubr.bf16.gmra.mrb[40].mxu1 %v3222_v53  ;;  %v3188_v55 = vmax.f32 %v4740_v59, 0.0  ;;  %v3190_v47 = vmax.f32 %v4772_v37, 0.0 }
 0x215   : > { %v4743_v45 = vadd.f32 %v2677_v41, %v6740_v20  ;;  %v4775_v0 = vadd.f32 %v3129_v50, %v6742_v21  ;;  %3762 = vmatpush1.bf16.msra.mxu0 %v6683_v1  ;;  %v3189_v57 = vmax.f32 %v4741_v61, 0.0  ;;  %v3191_v18 = vmax.f32 %v4773_v48, 0.0  ;;  %v5520_v1 = vld [vmem:[%s7029_s5 + $0x40] sm:$0xff]   ;;  %v5527_v20 = vld [vmem:[%s7029_s5 + $0x18] sm:$0xff]  }
 0x216   : > { %v3192_v51 = vmax.f32 %v4742_v62, 0.0  ;;  %v3194_v11 = vmax.f32 %v4774_v63, 0.0  ;;  %3763 = vmatprep.subr.bf16.mxu0 %v6690_v3  ;;  %v5521_v3 = vld [vmem:[%s7029_s5] sm:$0xff]   ;;  %4616 = vmatprep.subr.bf16.mxu1 %v5520_v1 }
 0x217   : > { %v3193_v14 = vmax.f32 %v4743_v45, 0.0  ;;  %v3195_v19 = vmax.f32 %v4775_v0, 0.0  ;;  %4617 = vmatpush3.bf16.msra.mxu1 %v5521_v3  ;;  %v5528_v21 = vld [vmem:[%s7029_s5 + $0x60] sm:$0xff]  }
 0x218   : > { %v3224_v22 = vpack.c.bf16 %v3192_v51, %v3188_v55  ;;  %v3226_v15 = vpack.c.bf16 %v3194_v11, %v3190_v47 }
 0x219   : > { %v3225_v46 = vpack.c.bf16 %v3193_v14, %v3189_v57  ;;  %v3227_v38 = vpack.c.bf16 %v3195_v19, %v3191_v18  ;;  %3764 = vmatpush1.bf16.msra.mxu0 %v6695_v5  ;;  %v5522_v5 = vld [vmem:[%s7029_s5 + $0x48] sm:$0xff]  }
 0x21a   : > { %3765 = vmatprep.subr.bf16.mxu0 %v6702_v6  ;;  %v5523_v6 = vld [vmem:[%s7029_s5 + $0x8] sm:$0xff]   ;;  %4618 = vmatprep.subr.bf16.mxu1 %v5522_v5 }
 0x21b   : > { %3726 = vmatprep.mubr.bf16.mxu0 %v3225_v46  ;;  %3839 = vmatprep.mubr.bf16.mxu1 %v3227_v38 }
 0x21c   : > { %3727 = vmatmul.mubr.bf16.gmra.mrb[60].mxu0 %v3224_v22  ;;  %3840 = vmatmul.mubr.bf16.gmra.mrb[44].mxu1 %v3226_v15 }
 0x21d   : > { %3766 = vmatpush1.bf16.msra.mxu0 %v6707_v7  ;;  %3769 = vmatprep.mubr.bf16.mxu0 %v6754_v23  ;;  %v5524_v7 = vld [vmem:[%s7029_s5 + $0x50] sm:$0xff]   ;;  %v5530_v23 = vld [vmem:[%s7029_s5 + $0x68] sm:$0xff]  }
 0x21e   : > { %3767 = vmatprep.subr.bf16.mxu0 %v6714_v9  ;;  %4619 = vmatpush3.bf16.msra.mxu1 %v5523_v6  ;;  %v5525_v9 = vld [vmem:[%s7029_s5 + $0x10] sm:$0xff]  }
 0x21f   : > { %4620 = vmatprep.subr.bf16.mxu1 %v5524_v7 }
 0x221   : > { %3768 = vmatpush1.bf16.msra.mxu0 %v6719_v10  ;;  %v5526_v10 = vld [vmem:[%s7029_s5 + $0x58] sm:$0xff]  }
 0x222   : > { %4621 = vmatpush3.bf16.msra.mxu1 %v5525_v9 }
 0x223   : > { %4622 = vmatprep.subr.bf16.mxu1 %v5526_v10 }
 0x224   : > { %3770 = vmatmul.mubr.bf16.vlgmr.msra.gmra.mrb[32].mxu0 %v6752_v17  ;;  %v5529_v17 = vld [vmem:[%s7029_s5 + $0x20] sm:$0xff]  }
 0x225   : > { %3779 = vmatprep.mubr.bf16.mxu0 %v6768_v25  ;;  %v5532_v25 = vld [vmem:[%s7029_s5 + $0x70] sm:$0xff]  }
 0x226   : > { %4623 = vmatpush3.bf16.msra.mxu1 %v5527_v20 }
 0x227   : > { %4624 = vmatprep.subr.bf16.mxu1 %v5528_v21 }
 0x22a   : > { %4625 = vmatpush3.bf16.msra.mxu1 %v5529_v17 }
 0x22b   : > { %4626 = vmatprep.subr.bf16.mxu1 %v5530_v23 }
 0x22c   : > { %3780 = vmatmul.mubr.bf16.gmra.mrb[36].mxu0 %v6766_v24  ;;  %v5531_v24 = vld [vmem:[%s7029_s5 + $0x28] sm:$0xff]  }
 0x22d   : > { %3789 = vmatprep.mubr.bf16.mxu0 %v6784_v33  ;;  %v5534_v33 = vld [vmem:[%s7029_s5 + $0x78] sm:$0xff]  }
 0x22e   : > { %4627 = vmatpush3.bf16.msra.mxu1 %v5531_v24 }
 0x22f   : > { %4628 = vmatprep.subr.bf16.mxu1 %v5532_v25 }
 0x234   : > { %3790 = vmatmul.mubr.bf16.gmra.mrb[40].mxu0 %v6782_v29  ;;  %v5533_v29 = vld [vmem:[%s7029_s5 + $0x30] sm:$0xff]  }
 0x235   : > { %3799 = vmatprep.mubr.bf16.mxu0 %v6800_v27  ;;  %4629 = vmatpush3.bf16.msra.mxu1 %v5533_v29  ;;  %v3292_v27 = vld [vmem:[%s7028_s4] sm:$0x3] }
 0x236   : > { %4630 = vmatprep.subr.bf16.mxu1 %v5534_v33  ;;  %v6916_v31 = vrot.slane %v3292_v27, %v610_v13  ;;  %v6920_v44 = vrot.slane %v3292_v27, %v614_v16 }
 0x23c   : > { %3800 = vmatmul.mubr.bf16.gmra.mrb[44].mxu0 %v6798_v26  ;;  %v5535_v26 = vld [vmem:[%s7029_s5 + $0x38] sm:$0xff]  }
 0x23d   : > { %4631 = vmatpush3.bf16.msra.mxu1 %v5535_v26 }
 0x2d7   : > { %v3698_v2 = vpop.f32.mrb[48].mxu0  ;;  %v3811_v58 = vpop.f32.mrb[32].mxu1 }
 0x2d8   : > { %v3699_v49 = vadd.f32 %v3698_v2, %v6916_v31  ;;  %v3700_v54 = vpop.f32.mrb[49].mxu0  ;;  %v3813_v42 = vpop.f32.mrb[33].mxu1 }
 0x2d9   : > { %v3701_v4 = vadd.f32 %v3700_v54, %v6920_v44  ;;  %v3702_v30 = vpop.f32.mrb[50].mxu0  ;;  %v3815_v52 = vpop.f32.mrb[34].mxu1 }
 0x2da   : > { %v3812_v56 = vadd.f32 %v3811_v58, %v3699_v49  ;;  %v3703_v32 = vadd.f32 %v3702_v30, %v6916_v31  ;;  %v3704_v28 = vpop.f32.mrb[51].mxu0  ;;  %v3817_v13 = vpop.f32.mrb[35].mxu1 }
 0x2db   : > { %v3814_v53 = vadd.f32 %v3813_v42, %v3701_v4  ;;  %v3705_v12 = vadd.f32 %v3704_v28, %v6920_v44 }
 0x2dc   : > { %v3816_v16 = vadd.f32 %v3815_v52, %v3703_v32  ;;  %v3866_v35 = vmax.f32 %v3812_v56, 0.0 }
 0x2dd   : > { %v3818_v34 = vadd.f32 %v3817_v13, %v3705_v12  ;;  %v3867_v36 = vmax.f32 %v3814_v53, 0.0 }
 0x2de   : > { %v3868_v8 = vmax.f32 %v3816_v16, 0.0 }
 0x2df   : > { %v3869_v59 = vmax.f32 %v3818_v34, 0.0  ;;  %v3708_v37 = vpop.f32.mrb[52].mxu0  ;;  %v3821_v60 = vpop.f32.mrb[36].mxu1 }
 0x2e0   : > { %v6926_v43 = vpack.c.bf16 %v3868_v8, %v3866_v35  ;;  %v3709_v61 = vadd.f32 %v3708_v37, %v6916_v31  ;;  %v3710_v48 = vpop.f32.mrb[53].mxu0  ;;  %v3823_v39 = vpop.f32.mrb[37].mxu1 }
 0x2e1   : > { %v6929_v40 = vpack.c.bf16 %v3869_v59, %v3867_v36  ;;  %v3711_v62 = vadd.f32 %v3710_v48, %v6920_v44  ;;  %v3712_v63 = vpop.f32.mrb[54].mxu0  ;;  %v3825_v41 = vpop.f32.mrb[38].mxu1 }
 0x2e2   : > { %v3822_v50 = vadd.f32 %v3821_v60, %v3709_v61  ;;  %v3713_v45 = vadd.f32 %v3712_v63, %v6916_v31  ;;  %v3714_v0 = vpop.f32.mrb[55].mxu0  ;;  %v3827_v55 = vpop.f32.mrb[39].mxu1 }
 0x2e3   : > { %v3824_v47 = vadd.f32 %v3823_v39, %v3711_v62  ;;  %v3715_v51 = vadd.f32 %v3714_v0, %v6920_v44 }
 0x2e4   : > { %v3826_v11 = vadd.f32 %v3825_v41, %v3713_v45  ;;  %v3870_v18 = vmax.f32 %v3822_v50, 0.0 }
 0x2e5   : > { %v3828_v57 = vadd.f32 %v3827_v55, %v3715_v51  ;;  %v3871_v19 = vmax.f32 %v3824_v47, 0.0 }
 0x2e6   : > { %v3872_v14 = vmax.f32 %v3826_v11, 0.0 }
 0x2e7   : > { %v3873_v22 = vmax.f32 %v3828_v57, 0.0  ;;  %v3718_v15 = vpop.f32.mrb[56].mxu0  ;;  %v3831_v46 = vpop.f32.mrb[40].mxu1 }
 0x2e8   : > { %v6934_v38 = vpack.c.bf16 %v3872_v14, %v3870_v18  ;;  %v3719_v1 = vadd.f32 %v3718_v15, %v6916_v31  ;;  %v3720_v3 = vpop.f32.mrb[57].mxu0  ;;  %v3833_v5 = vpop.f32.mrb[41].mxu1 }
 0x2e9   : > { %v6937_v6 = vpack.c.bf16 %v3873_v22, %v3871_v19  ;;  %v3721_v7 = vadd.f32 %v3720_v3, %v6920_v44  ;;  %v3722_v9 = vpop.f32.mrb[58].mxu0  ;;  %v3835_v10 = vpop.f32.mrb[42].mxu1 }
 0x2ea   : > { %v3832_v20 = vadd.f32 %v3831_v46, %v3719_v1  ;;  %v3723_v21 = vadd.f32 %v3722_v9, %v6916_v31  ;;  %v3724_v17 = vpop.f32.mrb[59].mxu0  ;;  %v3837_v23 = vpop.f32.mrb[43].mxu1 }
 0x2eb   : > { %v3834_v24 = vadd.f32 %v3833_v5, %v3721_v7  ;;  %v3725_v25 = vadd.f32 %v3724_v17, %v6920_v44 }
 0x2ec   : > { %v3836_v29 = vadd.f32 %v3835_v10, %v3723_v21  ;;  %v3874_v26 = vmax.f32 %v3832_v20, 0.0 }
 0x2ed   : > { %v3838_v33 = vadd.f32 %v3837_v23, %v3725_v25  ;;  %v3875_v2 = vmax.f32 %v3834_v24, 0.0 }
 0x2ee   : > { %v3876_v27 = vmax.f32 %v3836_v29, 0.0 }
 0x2ef   : > { %v3877_v58 = vmax.f32 %v3838_v33, 0.0  ;;  %v3728_v49 = vpop.f32.mrb[60].mxu0  ;;  %v3841_v54 = vpop.f32.mrb[44].mxu1 }
 0x2f0   : > { %v6942_v42 = vpack.c.bf16 %v3876_v27, %v3874_v26  ;;  %v3729_v4 = vadd.f32 %v3728_v49, %v6916_v31  ;;  %v3730_v30 = vpop.f32.mrb[61].mxu0  ;;  %v3843_v52 = vpop.f32.mrb[45].mxu1 }
 0x2f1   : > { %v6945_v56 = vpack.c.bf16 %v3877_v58, %v3875_v2  ;;  %v3731_v32 = vadd.f32 %v3730_v30, %v6920_v44  ;;  %v3732_v28 = vpop.f32.mrb[62].mxu0  ;;  %v3845_v13 = vpop.f32.mrb[46].mxu1 }
 0x2f2   : > { %v3842_v53 = vadd.f32 %v3841_v54, %v3729_v4  ;;  %v3733_v12 = vadd.f32 %v3732_v28, %v6916_v31  ;;  %v3734_v16 = vpop.f32.mrb[63].mxu0  ;;  %v3847_v34 = vpop.f32.mrb[47].mxu1 }
 0x2f3   : > { %v3844_v35 = vadd.f32 %v3843_v52, %v3731_v32  ;;  %v3735_v8 = vadd.f32 %v3734_v16, %v6920_v44 }
 0x2f4   : > { %v3846_v36 = vadd.f32 %v3845_v13, %v3733_v12  ;;  %v3878_v37 = vmax.f32 %v3842_v53, 0.0 }
 0x2f5   : > { %v3848_v59 = vadd.f32 %v3847_v34, %v3735_v8  ;;  %v3879_v61 = vmax.f32 %v3844_v35, 0.0 }
 0x2f6   : > { %v3880_v60 = vmax.f32 %v3846_v36, 0.0 }
 0x2f7   : > { %v3881_v48 = vmax.f32 %v3848_v59, 0.0  ;;  %v3771_v39 = vpop.f32.mrb[32].mxu0 }
 0x2f8   : > { %v6950_v62 = vpack.c.bf16 %v3880_v60, %v3878_v37  ;;  %v4776_v63 = vadd.f32 %v3771_v39, %v6916_v31  ;;  %v3773_v41 = vpop.f32.mrb[33].mxu0 }
 0x2f9   : > { %v6953_v50 = vpack.c.bf16 %v3881_v48, %v3879_v61  ;;  %v4777_v45 = vadd.f32 %v3773_v41, %v6920_v44  ;;  %v3775_v0 = vpop.f32.mrb[34].mxu0 }
 0x2fa   : > { %v4778_v55 = vadd.f32 %v3775_v0, %v6916_v31  ;;  %v3777_v47 = vpop.f32.mrb[35].mxu0  ;;  %v3850_v11 = vmax.f32 %v4776_v63, 0.0 }
 0x2fb   : > { %v4779_v51 = vadd.f32 %v3777_v47, %v6920_v44  ;;  %v3851_v18 = vmax.f32 %v4777_v45, 0.0 }
 0x2fc   : > { %v3852_v57 = vmax.f32 %v4778_v55, 0.0 }
 0x2fd   : > { %v3853_v14 = vmax.f32 %v4779_v51, 0.0 }
 0x2fe   : > { %v3882_v19 = vpack.c.bf16 %v3852_v57, %v3850_v11 }
 0x2ff   : > { %v3883_v22 = vpack.c.bf16 %v3853_v14, %v3851_v18  ;;  %v3781_v15 = vpop.f32.mrb[36].mxu0 }
 0x300   : > { %v4780_v46 = vadd.f32 %v3781_v15, %v6916_v31  ;;  %v3783_v1 = vpop.f32.mrb[37].mxu0 }
 0x301   : > { %v4781_v3 = vadd.f32 %v3783_v1, %v6920_v44  ;;  %v3785_v5 = vpop.f32.mrb[38].mxu0  ;;  %4065 = vmatprep.mubr.bf16.mxu1 %v3883_v22 }
 0x302   : > { %v4782_v7 = vadd.f32 %v3785_v5, %v6916_v31  ;;  %v3787_v9 = vpop.f32.mrb[39].mxu0  ;;  %4066 = vmatmul.mubr.bf16.vlgmr.msra.gmra.mrb[48].mxu1 %v3882_v19  ;;  %v3854_v20 = vmax.f32 %v4780_v46, 0.0 }
 0x303   : > { %v4783_v10 = vadd.f32 %v3787_v9, %v6920_v44  ;;  %v3855_v17 = vmax.f32 %v4781_v3, 0.0 }
 0x304   : > { %v3856_v21 = vmax.f32 %v4782_v7, 0.0 }
 0x305   : > { %v3857_v23 = vmax.f32 %v4783_v10, 0.0 }
 0x306   : > { %v3884_v24 = vpack.c.bf16 %v3856_v21, %v3854_v20 }
 0x307   : > { %v3885_v25 = vpack.c.bf16 %v3857_v23, %v3855_v17  ;;  %v3791_v29 = vpop.f32.mrb[40].mxu0 }
 0x308   : > { %v4784_v33 = vadd.f32 %v3791_v29, %v6916_v31  ;;  %v3793_v26 = vpop.f32.mrb[41].mxu0 }
 0x309   : > { %v4785_v27 = vadd.f32 %v3793_v26, %v6920_v44  ;;  %v3795_v2 = vpop.f32.mrb[42].mxu0  ;;  %4073 = vmatprep.mubr.bf16.mxu1 %v3885_v25 }
 0x30a   : > { %v4786_v58 = vadd.f32 %v3795_v2, %v6916_v31  ;;  %v3797_v49 = vpop.f32.mrb[43].mxu0  ;;  %4074 = vmatmul.mubr.bf16.gmra.mrb[52].mxu1 %v3884_v24  ;;  %v3858_v4 = vmax.f32 %v4784_v33, 0.0 }
 0x30b   : > { %v4787_v54 = vadd.f32 %v3797_v49, %v6920_v44  ;;  %v3859_v52 = vmax.f32 %v4785_v27, 0.0 }
 0x30c   : > { %v3860_v30 = vmax.f32 %v4786_v58, 0.0 }
 0x30d   : > { %v3861_v32 = vmax.f32 %v4787_v54, 0.0 }
 0x30e   : > { %v3886_v28 = vpack.c.bf16 %v3860_v30, %v3858_v4 }
 0x30f   : > { %v3887_v13 = vpack.c.bf16 %v3861_v32, %v3859_v52  ;;  %v3801_v53 = vpop.f32.mrb[44].mxu0 }
 0x310   : > { %v4788_v12 = vadd.f32 %v3801_v53, %v6916_v31  ;;  %v3803_v16 = vpop.f32.mrb[45].mxu0 }
 0x311   : > { %v4789_v34 = vadd.f32 %v3803_v16, %v6920_v44  ;;  %v3805_v35 = vpop.f32.mrb[46].mxu0  ;;  %4081 = vmatprep.mubr.bf16.mxu1 %v3887_v13 }
 0x312   : > { %v4790_v8 = vadd.f32 %v3805_v35, %v6916_v31  ;;  %v3807_v36 = vpop.f32.mrb[47].mxu0  ;;  %4082 = vmatmul.mubr.bf16.gmra.mrb[56].mxu1 %v3886_v28  ;;  %v3862_v37 = vmax.f32 %v4788_v12, 0.0 }
 0x313   : > { %v4791_v59 = vadd.f32 %v3807_v36, %v6920_v44  ;;  %v3863_v61 = vmax.f32 %v4789_v34, 0.0  ;;  %v6982_v44 = vld [vmem:[%s7030_s6] ss:$0 sm:$0xff] }
 0x314   : > { %v3864_v60 = vmax.f32 %v4790_v8, 0.0 }
 0x315   : > { %v3865_v48 = vmax.f32 %v4791_v59, 0.0 }
 0x316   : > { %v3888_v39 = vpack.c.bf16 %v3864_v60, %v3862_v37 }
 0x317   : > { %v3889_v63 = vpack.c.bf16 %v3865_v48, %v3863_v61 }
 0x319   : > { %4089 = vmatprep.mubr.bf16.mxu1 %v3889_v63 }
 0x31a   : > { %4090 = vmatmul.mubr.bf16.gmra.mrb[60].mxu1 %v3888_v39 }
 0x31b   : > { %4097 = vmatprep.mubr.bf16.mxu1 %v6929_v40 }
 0x322   : > { %4098 = vmatmul.mubr.bf16.gmra.mrb[64].mxu1 %v6926_v43 }
 0x323   : > { %4105 = vmatprep.mubr.bf16.mxu1 %v6937_v6 }
 0x32a   : > { %4106 = vmatmul.mubr.bf16.gmra.mrb[68].mxu1 %v6934_v38 }
 0x32b   : > { %4113 = vmatprep.mubr.bf16.mxu1 %v6945_v56 }
 0x332   : > { %4114 = vmatmul.mubr.bf16.gmra.mrb[72].mxu1 %v6942_v42 }
 0x333   : > { %4121 = vmatprep.mubr.bf16.mxu1 %v6953_v50 }
 0x33a   : > { %4122 = vmatmul.mubr.bf16.gmra.mrb[76].mxu1 %v6950_v62 }
 0x3d5   : > { %v4632_v31 = vpop.f32.mrb[48].mxu1 }
 0x3d6   : > { %v4633_v43 = vpop.f32.mrb[49].mxu1 }
 0x3d7   : > { %v4634_v40 = vadd.f32 %v4633_v43, %v4632_v31  ;;  %v4635_v6 = vpop.f32.mrb[50].mxu1 }
 0x3d8   : > { %v4636_v38 = vpop.f32.mrb[51].mxu1 }
 0x3d9   : > { %v4068_v42 = vadd.f32 %v4634_v40, %v6982_v44  ;;  %v4637_v56 = vadd.f32 %v4636_v38, %v4635_v6 }
 0x3db   : > { %4130 = vst [vmem:[%s6987_s19] sm:$0xff] %v4068_v42  ;;  %v4071_v62 = vadd.f32 %v4637_v56, %v6982_v44 }
 0x3dd   : > { %4131 = vst [vmem:[%s6987_s19 + $0x8] sm:$0xff] %v4071_v62  ;;  %v4638_v41 = vpop.f32.mrb[52].mxu1 }
 0x3de   : > { %v4639_v50 = vpop.f32.mrb[53].mxu1 }
 0x3df   : > { %v4640_v45 = vadd.f32 %v4639_v50, %v4638_v41  ;;  %v4641_v0 = vpop.f32.mrb[54].mxu1 }
 0x3e0   : > { %v4642_v55 = vpop.f32.mrb[55].mxu1 }
 0x3e1   : > { %v4076_v47 = vadd.f32 %v4640_v45, %v6982_v44  ;;  %v4643_v51 = vadd.f32 %v4642_v55, %v4641_v0 }
 0x3e3   : > { %4132 = vst [vmem:[%s6987_s19 + $0x10] sm:$0xff] %v4076_v47  ;;  %v4079_v11 = vadd.f32 %v4643_v51, %v6982_v44 }
 0x3e5   : > { %4133 = vst [vmem:[%s6987_s19 + $0x18] sm:$0xff] %v4079_v11  ;;  %v4644_v57 = vpop.f32.mrb[56].mxu1 }
 0x3e6   : > { %v4645_v18 = vpop.f32.mrb[57].mxu1 }
 0x3e7   : > { %v4646_v14 = vadd.f32 %v4645_v18, %v4644_v57  ;;  %v4647_v19 = vpop.f32.mrb[58].mxu1 }
 0x3e8   : > { %v4648_v22 = vpop.f32.mrb[59].mxu1 }
 0x3e9   : > { %v4084_v15 = vadd.f32 %v4646_v14, %v6982_v44  ;;  %v4649_v46 = vadd.f32 %v4648_v22, %v4647_v19 }
 0x3eb   : > { %4134 = vst [vmem:[%s6987_s19 + $0x20] sm:$0xff] %v4084_v15  ;;  %v4087_v1 = vadd.f32 %v4649_v46, %v6982_v44 }
 0x3ed   : > { %4135 = vst [vmem:[%s6987_s19 + $0x28] sm:$0xff] %v4087_v1  ;;  %v4650_v3 = vpop.f32.mrb[60].mxu1 }
 0x3ee   : > { %v4651_v5 = vpop.f32.mrb[61].mxu1 }
 0x3ef   : > { %v4652_v7 = vadd.f32 %v4651_v5, %v4650_v3  ;;  %v4653_v9 = vpop.f32.mrb[62].mxu1 }
 0x3f0   : > { %v4654_v10 = vpop.f32.mrb[63].mxu1 }
 0x3f1   : > { %v4092_v20 = vadd.f32 %v4652_v7, %v6982_v44  ;;  %v4655_v21 = vadd.f32 %v4654_v10, %v4653_v9 }
 0x3f3   : > { %4136 = vst [vmem:[%s6987_s19 + $0x30] sm:$0xff] %v4092_v20  ;;  %v4095_v17 = vadd.f32 %v4655_v21, %v6982_v44 }
 0x3f5   : > { %4137 = vst [vmem:[%s6987_s19 + $0x38] sm:$0xff] %v4095_v17  ;;  %v4656_v23 = vpop.f32.mrb[64].mxu1 }
 0x3f6   : > { %v4657_v24 = vpop.f32.mrb[65].mxu1 }
 0x3f7   : > { %v4658_v25 = vadd.f32 %v4657_v24, %v4656_v23  ;;  %v4659_v29 = vpop.f32.mrb[66].mxu1 }
 0x3f8   : > { %v4660_v33 = vpop.f32.mrb[67].mxu1 }
 0x3f9   : > { %v4100_v26 = vadd.f32 %v4658_v25, %v6982_v44  ;;  %v4661_v27 = vadd.f32 %v4660_v33, %v4659_v29 }
 0x3fb   : > { %4138 = vst [vmem:[%s6987_s19 + $0x40] sm:$0xff] %v4100_v26  ;;  %v4103_v2 = vadd.f32 %v4661_v27, %v6982_v44 }
 0x3fd   : > { %4139 = vst [vmem:[%s6987_s19 + $0x48] sm:$0xff] %v4103_v2  ;;  %v4662_v58 = vpop.f32.mrb[68].mxu1 }
 0x3fe   : > { %v4663_v49 = vpop.f32.mrb[69].mxu1 }
 0x3ff   : > { %v4664_v54 = vadd.f32 %v4663_v49, %v4662_v58  ;;  %v4665_v4 = vpop.f32.mrb[70].mxu1 }
 0x400   : > { %v4666_v30 = vpop.f32.mrb[71].mxu1 }
 0x401   : > { %v4108_v52 = vadd.f32 %v4664_v54, %v6982_v44  ;;  %v4667_v32 = vadd.f32 %v4666_v30, %v4665_v4 }
 0x403   : > { %4140 = vst [vmem:[%s6987_s19 + $0x50] sm:$0xff] %v4108_v52  ;;  %v4111_v28 = vadd.f32 %v4667_v32, %v6982_v44 }
 0x405   : > { %4141 = vst [vmem:[%s6987_s19 + $0x58] sm:$0xff] %v4111_v28  ;;  %v4668_v13 = vpop.f32.mrb[72].mxu1 }
 0x406   : > { %v4669_v53 = vpop.f32.mrb[73].mxu1 }
 0x407   : > { %v4670_v12 = vadd.f32 %v4669_v53, %v4668_v13  ;;  %v4671_v16 = vpop.f32.mrb[74].mxu1 }
 0x408   : > { %v4672_v34 = vpop.f32.mrb[75].mxu1 }
 0x409   : > { %v4116_v35 = vadd.f32 %v4670_v12, %v6982_v44  ;;  %v4673_v8 = vadd.f32 %v4672_v34, %v4671_v16 }
 0x40b   : > { %4142 = vst [vmem:[%s6987_s19 + $0x60] sm:$0xff] %v4116_v35  ;;  %v4119_v36 = vadd.f32 %v4673_v8, %v6982_v44 }
 0x40d   : > { %4143 = vst [vmem:[%s6987_s19 + $0x68] sm:$0xff] %v4119_v36  ;;  %v4674_v59 = vpop.f32.mrb[76].mxu1 }
 0x40e   : > { %v4675_v37 = vpop.f32.mrb[77].mxu1 }
 0x40f   : > { %v4676_v60 = vadd.f32 %v4675_v37, %v4674_v59  ;;  %v4677_v61 = vpop.f32.mrb[78].mxu1 }
 0x410   : > { %v4678_v48 = vpop.f32.mrb[79].mxu1 }
 0x411   : > { %v4124_v39 = vadd.f32 %v4676_v60, %v6982_v44  ;;  %v4679_v63 = vadd.f32 %v4678_v48, %v4677_v61 }
 0x413   : > { %4144 = vst [vmem:[%s6987_s19 + $0x70] sm:$0xff] %v4124_v39  ;;  %v4127_v31 = vadd.f32 %v4679_v63, %v6982_v44 }
 0x415   : > { %4145 = vst [vmem:[%s6987_s19 + $0x78] sm:$0xff] %v4127_v31 }
 0x416 PF: > { %s17_s24 = sadd.s32 1, %s5542_s24  }
 0x417   : > { %p14_p4 = scmp.ge.s32.totalorder %s17_s24, 4  }
 0x419   :  { %16 = sbr.rel (!%p14_p4) target bundleno = 1 (0x1), region = 78 }

</bundles_post_ra>
